<compile_context>
chip_gen: v6e
topology: v6e:2x2x1
jax: 0.10.0
libtpu: 0.0.40
codegen_flags: <defaults>
</compile_context>

<pallas_src>
import functools

import jax
import jax.numpy as jnp
from jax.experimental import pallas as pl
from jax.experimental.pallas import tpu as pltpu


def _round_up(n, m):
    return ((n + m - 1) // m) * m


def _generator_kernel(x_ref, n_ref,
                      w1a_ref, w1b_ref, b1_ref,
                      w2_ref, b2_ref,
                      w3_ref, b3_ref,
                      w4_ref, b4_ref,
                      o_ref):
    """One batch tile of the 4-layer MLP; weights/biases are VMEM-resident."""
    def lrelu(h):                      # nn.LeakyReLU(0.2), computed in f32
        return jnp.where(h > 0, h, 0.2 * h)

    # Layer 1: fused concat -> x@W1a + noise@W1b (f32 accumulation on MXU).
    h = (jnp.dot(x_ref[...], w1a_ref[...], preferred_element_type=jnp.float32)
         + jnp.dot(n_ref[...], w1b_ref[...], preferred_element_type=jnp.float32)
         + b1_ref[...])
    h = lrelu(h).astype(jnp.bfloat16)

    h = jnp.dot(h, w2_ref[...], preferred_element_type=jnp.float32) + b2_ref[...]
    h = lrelu(h).astype(jnp.bfloat16)

    h = jnp.dot(h, w3_ref[...], preferred_element_type=jnp.float32) + b3_ref[...]
    h = lrelu(h).astype(jnp.bfloat16)

    y = jnp.dot(h, w4_ref[...], preferred_element_type=jnp.float32) + b4_ref[...]
    o_ref[...] = y.astype(o_ref.dtype)      # exact-width f32 store (no padding)


def prepare_params(params, input_size):
    """One-time parameter prep (hoisted out of the per-call path):
    split W1 for the fused concat and cast matmul operands to bf16."""
    (w1, b1), (w2, b2), (w3, b3), (w4, b4) = params
    bf16 = lambda a: a.astype(jnp.bfloat16)
    f32 = lambda a: a.astype(jnp.float32)
    w1a, w1b = w1[:input_size], w1[input_size:]
    return (bf16(w1a), bf16(w1b), f32(b1),
            bf16(w2), f32(b2),
            bf16(w3), f32(b3),
            bf16(w4), f32(b4))


def generator_forward(x, noise, prep, *, tb=4096, core_parallel=False):
    """x: [B, input_size], noise: [B, noise_dim] -> [B, output_size] (f32).

    `prep` is the output of prepare_params(). bf16 MXU inputs with f32
    accumulation (results match an f32 reference to ~bf16 tolerance)."""
    w1a, w1b, b1, w2, b2, w3, b3, w4, b4 = prep
    B, input_size = x.shape
    noise_dim = noise.shape[1]
    hidden = w1a.shape[1]
    out_size = w4.shape[1]

    x_b = x.astype(jnp.bfloat16)
    n_b = noise.astype(jnp.bfloat16)

    # ---- batch tiling ------------------------------------------------------
    # Per-row VMEM (double-buffered acts + f32 out) is ~1 KB, so cap tb at 8192
    # to stay well inside v7x's 64 MiB VMEM; clamp to the padded batch so small
    # batches run in a single grid step (grid=(1,)).
    tb = int(min(max(tb, 16), 8192))
    tb = _round_up(tb, 16)                      # bf16 sublane packing
    b_fit = _round_up(B, 16)
    if b_fit <= tb:
        tb = b_fit
    B_pad = _round_up(B, tb)
    if B_pad != B:
        x_b = jnp.pad(x_b, ((0, B_pad - B), (0, 0)))
        n_b = jnp.pad(n_b, ((0, B_pad - B), (0, 0)))
    grid = (B_pad // tb,)

    act = lambda feat: pl.BlockSpec((tb, feat), lambda i: (i, 0))
    res = lambda a: pl.BlockSpec(a.shape, lambda i: (0, 0))   # VMEM-resident

    flops = 2 * B_pad * ((input_size + noise_dim) * hidden
                         + 2 * hidden * hidden + hidden * out_size)
    bytes_accessed = (2 * (x_b.size + n_b.size + w1a.size + w1b.size
                           + w2.size + w3.size + w4.size)
                      + 4 * (b1.size + b2.size + b3.size + b4.size)
                      + 4 * B_pad * out_size)

    # Plain "parallel" vs "arbitrary" is a measured no-op; CORE_PARALLEL is the
    # lever that actually shards the batch grid across v7x's two TensorCores.
    # Only worth it for large multi-step grids, so it is opt-in.
    if core_parallel and grid[0] > 1:
        dim_sem = (pltpu.CORE_PARALLEL,)
    else:
        dim_sem = ("arbitrary",)

    out = pl.pallas_call(
        _generator_kernel,
        out_shape=jax.ShapeDtypeStruct((B_pad, out_size), jnp.float32),
        grid=grid,
        in_specs=[act(input_size), act(noise_dim),
                  res(w1a), res(w1b), res(b1),
                  res(w2), res(b2),
                  res(w3), res(b3),
                  res(w4), res(b4)],
        out_specs=pl.BlockSpec((tb, out_size), lambda i: (i, 0)),
        compiler_params=pltpu.CompilerParams(dimension_semantics=dim_sem),
        cost_estimate=pl.CostEstimate(flops=flops, transcendentals=0,
                                      bytes_accessed=bytes_accessed),
    )(x_b, n_b, w1a, w1b, b1, w2, b2, w3, b3, w4, b4)

    return out[:B]


def init_params(key, input_size, output_size, noise_dim=3, hidden_dim=64):
    """Deterministic init. Weights stored as [in_features, out_features]
    (transpose of PyTorch nn.Linear.weight); biases as [1, out]."""
    dims = [(input_size + noise_dim, hidden_dim),
            (hidden_dim, hidden_dim),
            (hidden_dim, hidden_dim),
            (hidden_dim, output_size)]
    params = []
    for i, (fin, fout) in enumerate(dims):
        kw, kb = jax.random.split(jax.random.fold_in(key, i))
        bound = 1.0 / jnp.sqrt(float(fin))
        w = jax.random.uniform(kw, (fin, fout), jnp.float32, -bound, bound)
        b = jax.random.uniform(kb, (1, fout), jnp.float32, -bound, bound)
        params.append((w, b))
    return params


def _reference_forward(x, noise, params):
    h = jnp.concatenate([x, noise], axis=1)
    for i, (w, b) in enumerate(params):
        h = h @ w + b
        if i < len(params) - 1:
            h = jnp.where(h > 0, h, 0.2 * h)
    return h


if __name__ == "__main__":
    # Small shapes consistent with the module; B=200 is not a multiple of 16 so
    # the batch-padding path is exercised, and the whole batch fits one tile
    # (grid=(1,)) per the tiling policy.
    batch = 200
    input_size = 16
    output_size = 16
    noise_dim = 3
    hidden_dim = 64

    key = jax.random.PRNGKey(0)
    kx, kn, kp = jax.random.split(key, 3)
    x = jax.random.normal(kx, (batch, input_size), jnp.float32)
    noise = jax.random.normal(kn, (batch, noise_dim), jnp.float32)
    params = init_params(kp, input_size, output_size, noise_dim, hidden_dim)

    prep = prepare_params(params, input_size)          # hoisted one-time prep
    fwd = jax.jit(functools.partial(generator_forward, tb=4096))

    y = fwd(x, noise, prep)
    y = jax.block_until_ready(y)

    # Sanity-check against a pure-JAX f32 reference of the same math.
    # bf16 MXU inputs with f32 accumulation -> slightly looser tolerance.
    y_ref = _reference_forward(x, noise, params)
    assert y.shape == (batch, output_size)
    max_err = float(jnp.max(jnp.abs(y - y_ref)))
    assert jnp.allclose(y, y_ref, atol=5e-2, rtol=5e-2), max_err

    print("KERNEL_OK")
</pallas_src>

<mosaic_0001>
module attributes {stable_mosaic.version = 11 : i64} {
  func.func @_generator_kernel(%arg0: i32, %arg1: memref<208x16xbf16, #tpu.memory_space<vmem>>, %arg2: memref<208x3xbf16, #tpu.memory_space<vmem>>, %arg3: memref<16x64xbf16, #tpu.memory_space<vmem>>, %arg4: memref<3x64xbf16, #tpu.memory_space<vmem>>, %arg5: memref<1x64xf32, #tpu.memory_space<vmem>>, %arg6: memref<64x64xbf16, #tpu.memory_space<vmem>>, %arg7: memref<1x64xf32, #tpu.memory_space<vmem>>, %arg8: memref<64x64xbf16, #tpu.memory_space<vmem>>, %arg9: memref<1x64xf32, #tpu.memory_space<vmem>>, %arg10: memref<64x16xbf16, #tpu.memory_space<vmem>>, %arg11: memref<1x16xf32, #tpu.memory_space<vmem>>, %arg12: memref<208x16xf32, #tpu.memory_space<vmem>>) attributes {dimension_semantics = [#tpu.dimension_semantics<arbitrary>], iteration_bounds = array<i64: 1>, scalar_prefetch = 0 : i64, scratch_operands = 0 : i64, tpu.core_type = #tpu.core_type<tc>, window_params = [{transform_indices = @transform_0, window_bounds = array<i64: 208, 16>}, {transform_indices = @transform_1, window_bounds = array<i64: 208, 3>}, {pipeline_mode = #tpu.pipeline_mode<synchronous>, transform_indices = @transform_2, window_bounds = array<i64: 16, 64>}, {pipeline_mode = #tpu.pipeline_mode<synchronous>, transform_indices = @transform_3, window_bounds = array<i64: 3, 64>}, {pipeline_mode = #tpu.pipeline_mode<synchronous>, transform_indices = @transform_4, window_bounds = array<i64: 1, 64>}, {pipeline_mode = #tpu.pipeline_mode<synchronous>, transform_indices = @transform_5, window_bounds = array<i64: 64, 64>}, {pipeline_mode = #tpu.pipeline_mode<synchronous>, transform_indices = @transform_6, window_bounds = array<i64: 1, 64>}, {pipeline_mode = #tpu.pipeline_mode<synchronous>, transform_indices = @transform_7, window_bounds = array<i64: 64, 64>}, {pipeline_mode = #tpu.pipeline_mode<synchronous>, transform_indices = @transform_8, window_bounds = array<i64: 1, 64>}, {pipeline_mode = #tpu.pipeline_mode<synchronous>, transform_indices = @transform_9, window_bounds = array<i64: 64, 16>}, {pipeline_mode = #tpu.pipeline_mode<synchronous>, transform_indices = @transform_10, window_bounds = array<i64: 1, 16>}, {transform_indices = @transform_11, window_bounds = array<i64: 208, 16>}]} {
    %c0 = arith.constant 0 : index
    %c0_0 = arith.constant 0 : index
    %0 = vector.load %arg1[%c0, %c0_0] : memref<208x16xbf16, #tpu.memory_space<vmem>>, vector<208x16xbf16>
    %c0_1 = arith.constant 0 : index
    %c0_2 = arith.constant 0 : index
    %1 = vector.load %arg3[%c0_1, %c0_2] : memref<16x64xbf16, #tpu.memory_space<vmem>>, vector<16x64xbf16>
    %cst = arith.constant dense<0.000000e+00> : vector<208x64xf32>
    %2 = tpu.matmul %0, %1, %cst {dimension_numbers = #tpu.dot_dimension_numbers<[1], [0], [0], [1], [0, 0, 1, 1], [], []>} : vector<208x16xbf16>, vector<16x64xbf16>, vector<208x64xf32> -> vector<208x64xf32>
    %c0_3 = arith.constant 0 : index
    %c0_4 = arith.constant 0 : index
    %3 = vector.load %arg2[%c0_3, %c0_4] : memref<208x3xbf16, #tpu.memory_space<vmem>>, vector<208x3xbf16>
    %c0_5 = arith.constant 0 : index
    %c0_6 = arith.constant 0 : index
    %4 = vector.load %arg4[%c0_5, %c0_6] : memref<3x64xbf16, #tpu.memory_space<vmem>>, vector<3x64xbf16>
    %cst_7 = arith.constant dense<0.000000e+00> : vector<208x64xf32>
    %5 = tpu.matmul %3, %4, %cst_7 {dimension_numbers = #tpu.dot_dimension_numbers<[1], [0], [0], [1], [0, 0, 1, 1], [], []>} : vector<208x3xbf16>, vector<3x64xbf16>, vector<208x64xf32> -> vector<208x64xf32>
    %6 = arith.addf %2, %5 : vector<208x64xf32>
    %c0_8 = arith.constant 0 : index
    %c0_9 = arith.constant 0 : index
    %7 = vector.load %arg5[%c0_8, %c0_9] : memref<1x64xf32, #tpu.memory_space<vmem>>, vector<1x64xf32>
    %8 = vector.broadcast %7 : vector<1x64xf32> to vector<208x64xf32>
    %9 = arith.addf %6, %8 : vector<208x64xf32>
    %cst_10 = arith.constant 0.000000e+00 : f32
    %10 = vector.broadcast %cst_10 : f32 to vector<208x64xf32>
    %11 = arith.cmpf ogt, %9, %10 : vector<208x64xf32>
    %cst_11 = arith.constant 2.000000e-01 : f32
    %12 = vector.broadcast %cst_11 : f32 to vector<208x64xf32>
    %13 = arith.mulf %12, %9 : vector<208x64xf32>
    %14 = arith.select %11, %9, %13 : vector<208x64xi1>, vector<208x64xf32>
    %15 = arith.truncf %14 : vector<208x64xf32> to vector<208x64xbf16>
    %c0_12 = arith.constant 0 : index
    %c0_13 = arith.constant 0 : index
    %16 = vector.load %arg6[%c0_12, %c0_13] : memref<64x64xbf16, #tpu.memory_space<vmem>>, vector<64x64xbf16>
    %cst_14 = arith.constant dense<0.000000e+00> : vector<208x64xf32>
    %17 = tpu.matmul %15, %16, %cst_14 {dimension_numbers = #tpu.dot_dimension_numbers<[1], [0], [0], [1], [0, 0, 1, 1], [], []>} : vector<208x64xbf16>, vector<64x64xbf16>, vector<208x64xf32> -> vector<208x64xf32>
    %c0_15 = arith.constant 0 : index
    %c0_16 = arith.constant 0 : index
    %18 = vector.load %arg7[%c0_15, %c0_16] : memref<1x64xf32, #tpu.memory_space<vmem>>, vector<1x64xf32>
    %19 = vector.broadcast %18 : vector<1x64xf32> to vector<208x64xf32>
    %20 = arith.addf %17, %19 : vector<208x64xf32>
    %cst_17 = arith.constant 0.000000e+00 : f32
    %21 = vector.broadcast %cst_17 : f32 to vector<208x64xf32>
    %22 = arith.cmpf ogt, %20, %21 : vector<208x64xf32>
    %cst_18 = arith.constant 2.000000e-01 : f32
    %23 = vector.broadcast %cst_18 : f32 to vector<208x64xf32>
    %24 = arith.mulf %23, %20 : vector<208x64xf32>
    %25 = arith.select %22, %20, %24 : vector<208x64xi1>, vector<208x64xf32>
    %26 = arith.truncf %25 : vector<208x64xf32> to vector<208x64xbf16>
    %c0_19 = arith.constant 0 : index
    %c0_20 = arith.constant 0 : index
    %27 = vector.load %arg8[%c0_19, %c0_20] : memref<64x64xbf16, #tpu.memory_space<vmem>>, vector<64x64xbf16>
    %cst_21 = arith.constant dense<0.000000e+00> : vector<208x64xf32>
    %28 = tpu.matmul %26, %27, %cst_21 {dimension_numbers = #tpu.dot_dimension_numbers<[1], [0], [0], [1], [0, 0, 1, 1], [], []>} : vector<208x64xbf16>, vector<64x64xbf16>, vector<208x64xf32> -> vector<208x64xf32>
    %c0_22 = arith.constant 0 : index
    %c0_23 = arith.constant 0 : index
    %29 = vector.load %arg9[%c0_22, %c0_23] : memref<1x64xf32, #tpu.memory_space<vmem>>, vector<1x64xf32>
    %30 = vector.broadcast %29 : vector<1x64xf32> to vector<208x64xf32>
    %31 = arith.addf %28, %30 : vector<208x64xf32>
    %cst_24 = arith.constant 0.000000e+00 : f32
    %32 = vector.broadcast %cst_24 : f32 to vector<208x64xf32>
    %33 = arith.cmpf ogt, %31, %32 : vector<208x64xf32>
    %cst_25 = arith.constant 2.000000e-01 : f32
    %34 = vector.broadcast %cst_25 : f32 to vector<208x64xf32>
    %35 = arith.mulf %34, %31 : vector<208x64xf32>
    %36 = arith.select %33, %31, %35 : vector<208x64xi1>, vector<208x64xf32>
    %37 = arith.truncf %36 : vector<208x64xf32> to vector<208x64xbf16>
    %c0_26 = arith.constant 0 : index
    %c0_27 = arith.constant 0 : index
    %38 = vector.load %arg10[%c0_26, %c0_27] : memref<64x16xbf16, #tpu.memory_space<vmem>>, vector<64x16xbf16>
    %cst_28 = arith.constant dense<0.000000e+00> : vector<208x16xf32>
    %39 = tpu.matmul %37, %38, %cst_28 {dimension_numbers = #tpu.dot_dimension_numbers<[1], [0], [0], [1], [0, 0, 1, 1], [], []>} : vector<208x64xbf16>, vector<64x16xbf16>, vector<208x16xf32> -> vector<208x16xf32>
    %c0_29 = arith.constant 0 : index
    %c0_30 = arith.constant 0 : index
    %40 = vector.load %arg11[%c0_29, %c0_30] : memref<1x16xf32, #tpu.memory_space<vmem>>, vector<1x16xf32>
    %41 = vector.broadcast %40 : vector<1x16xf32> to vector<208x16xf32>
    %42 = arith.addf %39, %41 : vector<208x16xf32>
    %c0_31 = arith.constant 0 : index
    %c0_32 = arith.constant 0 : index
    %43 = vector.load %arg12[%c0_31, %c0_32] : memref<208x16xf32, #tpu.memory_space<vmem>>, vector<208x16xf32>
    tpu.vector_store %arg12[%c0_31, %c0_32], %42 {strides = array<i32>} : memref<208x16xf32, #tpu.memory_space<vmem>>, vector<208x16xf32>,
    return
  }
  func.func @transform_0(%arg0: i32) -> (i32, i32) {
    %c0_i32 = arith.constant 0 : i32
    %c0_i32_0 = arith.constant 0 : i32
    return %arg0, %c0_i32 : i32, i32
  }
  func.func @transform_1(%arg0: i32) -> (i32, i32) {
    %c0_i32 = arith.constant 0 : i32
    %c0_i32_0 = arith.constant 0 : i32
    return %arg0, %c0_i32 : i32, i32
  }
  func.func @transform_2(%arg0: i32) -> (i32, i32) {
    %c0_i32 = arith.constant 0 : i32
    %c0_i32_0 = arith.constant 0 : i32
    %c0_i32_1 = arith.constant 0 : i32
    return %c0_i32, %c0_i32_0 : i32, i32
  }
  func.func @transform_3(%arg0: i32) -> (i32, i32) {
    %c0_i32 = arith.constant 0 : i32
    %c0_i32_0 = arith.constant 0 : i32
    %c0_i32_1 = arith.constant 0 : i32
    return %c0_i32, %c0_i32_0 : i32, i32
  }
  func.func @transform_4(%arg0: i32) -> (i32, i32) {
    %c0_i32 = arith.constant 0 : i32
    %c0_i32_0 = arith.constant 0 : i32
    %c0_i32_1 = arith.constant 0 : i32
    return %c0_i32, %c0_i32_0 : i32, i32
  }
  func.func @transform_5(%arg0: i32) -> (i32, i32) {
    %c0_i32 = arith.constant 0 : i32
    %c0_i32_0 = arith.constant 0 : i32
    %c0_i32_1 = arith.constant 0 : i32
    return %c0_i32, %c0_i32_0 : i32, i32
  }
  func.func @transform_6(%arg0: i32) -> (i32, i32) {
    %c0_i32 = arith.constant 0 : i32
    %c0_i32_0 = arith.constant 0 : i32
    %c0_i32_1 = arith.constant 0 : i32
    return %c0_i32, %c0_i32_0 : i32, i32
  }
  func.func @transform_7(%arg0: i32) -> (i32, i32) {
    %c0_i32 = arith.constant 0 : i32
    %c0_i32_0 = arith.constant 0 : i32
    %c0_i32_1 = arith.constant 0 : i32
    return %c0_i32, %c0_i32_0 : i32, i32
  }
  func.func @transform_8(%arg0: i32) -> (i32, i32) {
    %c0_i32 = arith.constant 0 : i32
    %c0_i32_0 = arith.constant 0 : i32
    %c0_i32_1 = arith.constant 0 : i32
    return %c0_i32, %c0_i32_0 : i32, i32
  }
  func.func @transform_9(%arg0: i32) -> (i32, i32) {
    %c0_i32 = arith.constant 0 : i32
    %c0_i32_0 = arith.constant 0 : i32
    %c0_i32_1 = arith.constant 0 : i32
    return %c0_i32, %c0_i32_0 : i32, i32
  }
  func.func @transform_10(%arg0: i32) -> (i32, i32) {
    %c0_i32 = arith.constant 0 : i32
    %c0_i32_0 = arith.constant 0 : i32
    %c0_i32_1 = arith.constant 0 : i32
    return %c0_i32, %c0_i32_0 : i32, i32
  }
  func.func @transform_11(%arg0: i32) -> (i32, i32) {
    %c0_i32 = arith.constant 0 : i32
    %c0_i32_0 = arith.constant 0 : i32
    return %arg0, %c0_i32 : i32, i32
  }
}

</mosaic_0001>

<bundles_post_ra>
// kernel: generator_forward.1
= control target key start
LH: loop header
LB: loop body
LE: loop exit
PB: predicated region body
PF: predicated region fallthrough
CT: control target
= control target key end

     0   :  { %vm199_vm0 = vcmask 1040384   ;;  %vm200_vm1 = vcmask 1041408   ;;  %v2092_v0 = vmov 0.0   ;;  %v2093_v2 = vmov 65535   ;;  %s2785_s3 = inlined_call_operand.vmem [shape: bf16[3,64], index: 3, kind: input, shape index: {}]   ;;  %s2786_s1 = inlined_call_operand.vmem [shape: bf16[208,3], index: 1, kind: input, shape index: {}]   ;;  %s2787_s2 = inlined_call_operand.vmem [shape: bf16[16,64], index: 2, kind: input, shape index: {}]   ;;  %s2788_s0 = inlined_call_operand.vmem [shape: bf16[208,16], index: 0, kind: input, shape index: {}]   ;;  %s2789_s5 = inlined_call_operand.vmem [shape: bf16[64,64], index: 5, kind: input, shape index: {}]   ;;  %s2790_s7 = inlined_call_operand.vmem [shape: bf16[64,64], index: 7, kind: input, shape index: {}]   ;;  %s2791_s4 = inlined_call_operand.vmem [shape: f32[1,64], index: 4, kind: input, shape index: {}]   ;;  %s2792_s9 = inlined_call_operand.vmem [shape: bf16[64,16], index: 9, kind: input, shape index: {}]   ;;  %s2793_s6 = inlined_call_operand.vmem [shape: f32[1,64], index: 6, kind: input, shape index: {}]   ;;  %s2794_s8 = inlined_call_operand.vmem [shape: f32[1,64], index: 8, kind: input, shape index: {}]   ;;  %s2795_s10 = inlined_call_operand.vmem [shape: f32[1,16], index: 10, kind: input, shape index: {}]   ;;  %s2796_s11 = inlined_call_operand.vmem [shape: f32[208,16], index: 11, kind: output, shape index: {}]  }
   0x1   :  { %2048 = vmatprep.subr.bf16.mxu1 %v2092_v0  ;;  %v93_v1 = vld [vmem:[%s2785_s3] sm:$0x3]  ;;  %v201_v3 = vsel %vm199_vm0, 4294967295, %v2093_v2  ;;  %1760 = vmatprep.subr.bf16.mxu0 %v2092_v0  ;;  %vm2094_vm2 = vmmov 0   ;;  %v2053_v6 = vld [vmem:[%s2786_s1 + $0x38] sm:$0xff]   ;;  %vm159_vm3 = vcmask 23552  }
   0x2   :  { %v202_v4 = vsel %vm200_vm1, %v201_v3, 0  ;;  %1790 = vmatprep.mubr.msk.bf16.mxu1 %vm2094_vm2, %v2092_v0  ;;  %1762 = vmatprep.mubr.msk.bf16.mxu0 %vm2094_vm2, %v2092_v0  ;;  %v2054_v7 = vld [vmem:[%s2787_s2] sm:$0xff]   ;;  %v2062_v10 = vld [vmem:[%s2786_s1 + $0x8] sm:$0xff]   ;;  %v2064_v12 = vld [vmem:[%s2786_s1 + $0x10] sm:$0xff]   ;;  %vm414_vm4 = vcmask 130048   ;;  %vm754_vm7 = vcmask 523264  }
   0x3   :  { %v204_v5 = vand.u32 %v202_v4, %v93_v1  ;;  %v2060_v8 = vld [vmem:[%s2786_s1] sm:$0xff]   ;;  %v2056_v11 = vld [vmem:[%s2786_s1 + $0x48] sm:$0xff]   ;;  %v2057_v13 = vld [vmem:[%s2786_s1 + $0x50] sm:$0xff]  }
   0x4   :  { %v2055_v9 = vld [vmem:[%s2786_s1 + $0x40] sm:$0xff]   ;;  %v2066_v14 = vld [vmem:[%s2786_s1 + $0x18] sm:$0xff]   ;;  %v2070_v18 = vld [vmem:[%s2786_s1 + $0x28] sm:$0xff]  }
   0x5   :  { %2049 = vmatpush3.bf16.msra.mxu1 %v204_v5  ;;  %1761 = vmatpush3.bf16.msra.mxu0 %v204_v5  ;;  %v2058_v15 = vld [vmem:[%s2786_s1 + $0x58] sm:$0xff]   ;;  %v2068_v16 = vld [vmem:[%s2786_s1 + $0x20] sm:$0xff]   ;;  %v2072_v20 = vld [vmem:[%s2786_s1 + $0x30] sm:$0xff]  }
   0x6   :  { %1814 = vmatprep.subr.bf16.mxu1 %v2092_v0  ;;  %1868 = vmatprep.subr.bf16.mxu0 %v2092_v0  ;;  %v2059_v17 = vld [vmem:[%s2786_s1 + $0x60] sm:$0xff]   ;;  %v2063_v21 = vld [vmem:[%s2788_s0 + $0x8] sm:$0xff]   ;;  %v2065_v22 = vld [vmem:[%s2788_s0 + $0x10] sm:$0xff]  }
   0x7   :  { %v2061_v19 = vld [vmem:[%s2788_s0] sm:$0xff]   ;;  %v2067_v23 = vld [vmem:[%s2788_s0 + $0x18] sm:$0xff]   ;;  %v2071_v26 = vld [vmem:[%s2788_s0 + $0x28] sm:$0xff]  }
   0x8   :  { %1791 = vmatmul.mubr.msk.bf16.vlgmr.msra.gmra.mxu1 %vm159_vm3, %v2053_v6  ;;  %1763 = vmatmul.mubr.msk.bf16.vlgmr.msra.gmra.mxu0 %vm159_vm3, %v2060_v8  ;;  %v2080_v24 = vld [vmem:[%s2789_s5 + $0x18] sm:$0xff]   ;;  %v2069_v25 = vld [vmem:[%s2788_s0 + $0x20] sm:$0xff]   ;;  %v2081_v27 = vld [vmem:[%s2789_s5 + $0x10] sm:$0xff]  }
   0x9   :  { %1815 = vmatpush3.bf16.msra.mxu1 %v2054_v7  ;;  %1794 = vmatprep.mubr.msk.bf16.mxu1 %vm2094_vm2, %v2092_v0  ;;  %v2073_v28 = vld [vmem:[%s2788_s0 + $0x30] sm:$0xff]   ;;  %v2082_v29 = vld [vmem:[%s2789_s5 + $0x8] sm:$0xff]   ;;  %v2074_v30 = vld [vmem:[%s2788_s0 + $0x38] sm:$0xff]  }
   0xa   :  { %1928 = vmatprep.subr.bf16.mxu1 %v2092_v0  ;;  %1766 = vmatprep.mubr.msk.bf16.mxu0 %vm2094_vm2, %v2092_v0  ;;  %v2075_v31 = vld [vmem:[%s2788_s0 + $0x40] sm:$0xff]   ;;  %v2076_v32 = vld [vmem:[%s2788_s0 + $0x48] sm:$0xff]   ;;  %v2077_v34 = vld [vmem:[%s2788_s0 + $0x50] sm:$0xff]  }
   0xb   :  { %1869 = vmatpush3.bf16.msra.mxu0 %v2080_v24  ;;  %v2083_v33 = vld [vmem:[%s2789_s5] sm:$0xff]   ;;  %v2078_v35 = vld [vmem:[%s2788_s0 + $0x58] sm:$0xff]   ;;  %v2085_v8 = vld [vmem:[%s2790_s7 + $0x10] sm:$0xff]  }
   0xc   :  { %1870 = vmatprep.subr.bf16.mxu0 %v2092_v0  ;;  %v2079_v36 = vld [vmem:[%s2788_s0 + $0x60] sm:$0xff]   ;;  %v2084_v5 = vld [vmem:[%s2790_s7 + $0x18] sm:$0xff]  }
   0xf   :  { %1871 = vmatpush3.bf16.msra.mxu0 %v2081_v27 }
  0x10   :  { %1795 = vmatmul.mubr.msk.bf16.gmra.mxu1 %vm159_vm3, %v2055_v9  ;;  %1767 = vmatmul.mubr.msk.bf16.gmra.mxu0 %vm159_vm3, %v2062_v10 }
  0x11   :  { %1798 = vmatprep.mubr.msk.bf16.mxu1 %vm2094_vm2, %v2092_v0  ;;  %1770 = vmatprep.mubr.msk.bf16.mxu0 %vm2094_vm2, %v2092_v0 }
  0x12   :  { %1872 = vmatprep.subr.bf16.mxu0 %v2092_v0 }
  0x13   :  { %1873 = vmatpush3.bf16.msra.mxu0 %v2082_v29 }
  0x14   :  { %1874 = vmatprep.subr.bf16.mxu0 %v2092_v0 }
  0x17   :  { %1875 = vmatpush3.bf16.msra.mxu0 %v2083_v33 }
  0x18   :  { %1799 = vmatmul.mubr.msk.bf16.gmra.mxu1 %vm159_vm3, %v2056_v11  ;;  %1771 = vmatmul.mubr.msk.bf16.gmra.mxu0 %vm159_vm3, %v2064_v12 }
  0x19   :  { %1802 = vmatprep.mubr.msk.bf16.mxu1 %vm2094_vm2, %v2092_v0  ;;  %1774 = vmatprep.mubr.msk.bf16.mxu0 %vm2094_vm2, %v2092_v0 }
  0x1a   :  { %1988 = vmatprep.subr.bf16.mxu0 %v2092_v0 }
  0x20   :  { %1803 = vmatmul.mubr.msk.bf16.gmra.mxu1 %vm159_vm3, %v2057_v13  ;;  %1775 = vmatmul.mubr.msk.bf16.gmra.mxu0 %vm159_vm3, %v2066_v14  ;;  %v2086_v13 = vld [vmem:[%s2790_s7 + $0x8] sm:$0xff]  }
  0x21   :  { %1806 = vmatprep.mubr.msk.bf16.mxu1 %vm2094_vm2, %v2092_v0  ;;  %1778 = vmatprep.mubr.msk.bf16.mxu0 %vm2094_vm2, %v2092_v0 }
  0x28   :  { %1807 = vmatmul.mubr.msk.bf16.gmra.mxu1 %vm159_vm3, %v2058_v15  ;;  %1779 = vmatmul.mubr.msk.bf16.gmra.mxu0 %vm159_vm3, %v2068_v16 }
  0x29   :  { %1810 = vmatprep.mubr.msk.bf16.mxu1 %vm2094_vm2, %v2092_v0  ;;  %1782 = vmatprep.mubr.msk.bf16.mxu0 %vm2094_vm2, %v2092_v0 }
  0x30   :  { %1811 = vmatmul.mubr.msk.bf16.gmra.mxu1 %vm159_vm3, %v2059_v17  ;;  %1783 = vmatmul.mubr.msk.bf16.gmra.mxu0 %vm159_vm3, %v2070_v18  ;;  %v2087_v18 = vld [vmem:[%s2790_s7] sm:$0xff]  }
  0x31   :  { %1816 = vmatprep.mubr.msk.bf16.mxu1 %vm2094_vm2, %v2092_v0  ;;  %1786 = vmatprep.mubr.msk.bf16.mxu0 %vm2094_vm2, %v2092_v0 }
  0x38   :  { %1817 = vmatmul.mubr.msk.bf16.vlgmr.msra.gmra.mxu1 %vm414_vm4, %v2061_v19  ;;  %1787 = vmatmul.mubr.msk.bf16.gmra.mxu0 %vm159_vm3, %v2072_v20 }
  0x39   :  { %1820 = vmatprep.mubr.msk.bf16.mxu1 %vm2094_vm2, %v2092_v0  ;;  %1876 = vmatprep.mubr.msk.bf16.mxu0 %vm2094_vm2, %v2092_v0 }
  0x3a   :  { %1929 = vmatpush3.bf16.msra.mxu1 %v2084_v5 }
  0x3b   :  { %1930 = vmatprep.subr.bf16.mxu1 %v2092_v0 }
  0x3e   :  { %1931 = vmatpush3.bf16.msra.mxu1 %v2085_v8 }
  0x3f   :  { %1932 = vmatprep.subr.bf16.mxu1 %v2092_v0 }
  0x40   :  { %1821 = vmatmul.mubr.msk.bf16.gmra.mxu1 %vm414_vm4, %v2063_v21 }
  0x41   :  { %1824 = vmatprep.mubr.msk.bf16.mxu1 %vm2094_vm2, %v2092_v0 }
  0x42   :  { %1933 = vmatpush3.bf16.msra.mxu1 %v2086_v13 }
  0x43   :  { %1934 = vmatprep.subr.bf16.mxu1 %v2092_v0 }
  0x46   :  { %1935 = vmatpush3.bf16.msra.mxu1 %v2087_v18 }
  0x48   :  { %1825 = vmatmul.mubr.msk.bf16.gmra.mxu1 %vm414_vm4, %v2065_v22 }
  0x49   :  { %1828 = vmatprep.mubr.msk.bf16.mxu1 %vm2094_vm2, %v2092_v0 }
  0x50   :  { %1829 = vmatmul.mubr.msk.bf16.gmra.mxu1 %vm414_vm4, %v2067_v23 }
  0x51   :  { %1832 = vmatprep.mubr.msk.bf16.mxu1 %vm2094_vm2, %v2092_v0 }
  0x58   :  { %1833 = vmatmul.mubr.msk.bf16.gmra.mxu1 %vm414_vm4, %v2069_v25 }
  0x59   :  { %1836 = vmatprep.mubr.msk.bf16.mxu1 %vm2094_vm2, %v2092_v0 }
  0x60   :  { %1837 = vmatmul.mubr.msk.bf16.gmra.mxu1 %vm414_vm4, %v2071_v26  ;;  %v2404_v26 = vld [vmem:[%s2791_s4] ss:$0 sm:$0xff] }
  0x61   :  { %1840 = vmatprep.mubr.msk.bf16.mxu1 %vm2094_vm2, %v2092_v0 }
  0x68   :  { %1841 = vmatmul.mubr.msk.bf16.gmra.mxu1 %vm414_vm4, %v2073_v28 }
  0x69   :  { %1844 = vmatprep.mubr.msk.bf16.mxu1 %vm2094_vm2, %v2092_v0 }
  0x70   :  { %1845 = vmatmul.mubr.msk.bf16.gmra.mxu1 %vm414_vm4, %v2074_v30 }
  0x71   :  { %1848 = vmatprep.mubr.msk.bf16.mxu1 %vm2094_vm2, %v2092_v0 }
  0x78   :  { %1849 = vmatmul.mubr.msk.bf16.gmra.mxu1 %vm414_vm4, %v2075_v31 }
  0x79   :  { %1852 = vmatprep.mubr.msk.bf16.mxu1 %vm2094_vm2, %v2092_v0 }
  0x80   :  { %1853 = vmatmul.mubr.msk.bf16.gmra.mxu1 %vm414_vm4, %v2076_v32 }
  0x81   :  { %1856 = vmatprep.mubr.msk.bf16.mxu1 %vm2094_vm2, %v2092_v0 }
  0x88   :  { %1857 = vmatmul.mubr.msk.bf16.gmra.mxu1 %vm414_vm4, %v2077_v34 }
  0x89   :  { %1860 = vmatprep.mubr.msk.bf16.mxu1 %vm2094_vm2, %v2092_v0 }
  0x90   :  { %1861 = vmatmul.mubr.msk.bf16.gmra.mxu1 %vm414_vm4, %v2078_v35 }
  0x91   :  { %1864 = vmatprep.mubr.msk.bf16.mxu1 %vm2094_vm2, %v2092_v0 }
  0x98   :  { %1865 = vmatmul.mubr.msk.bf16.gmra.mxu1 %vm414_vm4, %v2079_v36 }
  0x99   :  { %1936 = vmatprep.mubr.msk.bf16.mxu1 %vm2094_vm2, %v2092_v0 }
  0xc8   :  { %v2342_v37 = vpop.f32.mrf.mxu1  ;;  %v240_v39 = vpop.f32.mrf.mxu0 }
  0xca   :  { %v1792_v38 = vpop.f32.mrf.mxu1  ;;  %v1764_v41 = vpop.f32.mrf.mxu0 }
  0xcc   :  { %v2344_v40 = vpop.f32.mrf.mxu1  ;;  %v243_v43 = vpop.f32.mrf.mxu0 }
  0xce   :  { %v1793_v42 = vpop.f32.mrf.mxu1  ;;  %v1765_v45 = vpop.f32.mrf.mxu0 }
  0xd0   :  { %v2346_v44 = vpop.f32.mrf.mxu1  ;;  %v2348_v47 = vpop.f32.mrf.mxu0 }
  0xd2   :  { %v1796_v46 = vpop.f32.mrf.mxu1  ;;  %v1768_v49 = vpop.f32.mrf.mxu0 }
  0xd4   :  { %v2350_v48 = vpop.f32.mrf.mxu1  ;;  %v2352_v51 = vpop.f32.mrf.mxu0 }
  0xd6   :  { %v1797_v50 = vpop.f32.mrf.mxu1  ;;  %v1769_v53 = vpop.f32.mrf.mxu0 }
  0xd8   :  { %v2354_v52 = vpop.f32.mrf.mxu1  ;;  %v2356_v55 = vpop.f32.mrf.mxu0 }
  0xda   :  { %v1800_v54 = vpop.f32.mrf.mxu1  ;;  %v1772_v57 = vpop.f32.mrf.mxu0 }
  0xdc   :  { %v2358_v56 = vpop.f32.mrf.mxu1  ;;  %v2360_v59 = vpop.f32.mrf.mxu0 }
  0xde   :  { %v1801_v58 = vpop.f32.mrf.mxu1  ;;  %v1773_v61 = vpop.f32.mrf.mxu0 }
  0xe0   :  { %v2362_v60 = vpop.f32.mrf.mxu1  ;;  %v2364_v63 = vpop.f32.mrf.mxu0 }
  0xe2   :  { %v1804_v62 = vpop.f32.mrf.mxu1  ;;  %v1776_v2 = vpop.f32.mrf.mxu0 }
  0xe4   :  { %v2366_v1 = vpop.f32.mrf.mxu1  ;;  %v2368_v4 = vpop.f32.mrf.mxu0 }
  0xe6   :  { %v1805_v3 = vpop.f32.mrf.mxu1  ;;  %v1777_v7 = vpop.f32.mrf.mxu0 }
  0xe8   :  { %v2373_v6 = vpop.f32.mrf.mxu1  ;;  %v2379_v10 = vpop.f32.mrf.mxu0 }
  0xea   :  { %v1808_v9 = vpop.f32.mrf.mxu1  ;;  %v1780_v12 = vpop.f32.mrf.mxu0 }
  0xec   :  { %v2381_v11 = vpop.f32.mrf.mxu1  ;;  %v2387_v15 = vpop.f32.mrf.mxu0 }
  0xee   :  { %v1809_v14 = vpop.f32.mrf.mxu1  ;;  %v1781_v17 = vpop.f32.mrf.mxu0 }
  0xf0   :  { %v2389_v16 = vpop.f32.mrf.mxu1  ;;  %v2395_v20 = vpop.f32.mrf.mxu0 }
  0xf2   :  { %v1812_v19 = vpop.f32.mrf.mxu1  ;;  %v1784_v22 = vpop.f32.mrf.mxu0 }
  0xf4   :  { %v2397_v21 = vpop.f32.mrf.mxu1  ;;  %v2399_v24 = vpop.f32.mrf.mxu0 }
  0xf6   :  { %v1813_v23 = vpop.f32.mrf.mxu1  ;;  %v1785_v28 = vpop.f32.mrf.mxu0 }
  0xf8   :  { %v488_v25 = vpop.f32.mrf.mxu1  ;;  %v2407_v31 = vpop.f32.mrf.mxu0 }
  0xf9   :  { %v489_v27 = vadd.f32 %v488_v25, %v240_v39 }
  0xfa   :  { %v1818_v29 = vpop.f32.mrf.mxu1  ;;  %v1788_v34 = vpop.f32.mrf.mxu0 }
  0xfb   :  { %v598_v30 = vadd.f32 %v2404_v26, %v489_v27 }
  0xfc   :  { %v491_v32 = vpop.f32.mrf.mxu1  ;;  %v2410_v41 = vpop.f32.mrf.mxu0 }
  0xfd   :  { %v492_v33 = vadd.f32 %v491_v32, %v243_v43  ;;  %v650_v36 = vmul.f32 0.2, %v598_v30  ;;  %vm624_vm5 = vcmp.gt.f32.partialorder %v598_v30, 0.0 }
  0xfe   :  { %v1819_v35 = vpop.f32.mrf.mxu1  ;;  %v1789_v46 = vpop.f32.mrf.mxu0 }
  0xff   :  { %v599_v38 = vadd.f32 %v2404_v26, %v492_v33  ;;  %v676_v50 = vsel %vm624_vm5, %v598_v30, %v650_v36 }
 0x100   :  { %v496_v42 = vpop.f32.mrf.mxu1 }
 0x101   :  { %vm625_vm6 = vcmp.gt.f32.partialorder %v599_v38, 0.0  ;;  %v651_v45 = vmul.f32 0.2, %v599_v38  ;;  %v497_v39 = vadd.f32 %v496_v42, %v2348_v47 }
 0x102   :  { %v1822_v49 = vpop.f32.mrf.mxu1 }
 0x103   :  { %v677_v53 = vsel %vm625_vm6, %v599_v38, %v651_v45  ;;  %v600_v54 = vadd.f32 %v2404_v26, %v497_v39 }
 0x104   :  { %v702_v43 = vpack.c.bf16 %v677_v53, %v676_v50  ;;  %v499_v57 = vpop.f32.mrf.mxu1 }
 0x105   :  { %v500_v58 = vadd.f32 %v499_v57, %v2352_v51  ;;  %v652_v62 = vmul.f32 0.2, %v600_v54  ;;  %vm626_vm8 = vcmp.gt.f32.partialorder %v600_v54, 0.0 }
 0x106   :  { %v1823_v61 = vpop.f32.mrf.mxu1  ;;  %1877 = vmatmul.mubr.msk.bf16.vlgmr.msra.gmra.mxu0 %vm754_vm7, %v702_v43 }
 0x107   :  { %v601_v2 = vadd.f32 %v2404_v26, %v500_v58  ;;  %1880 = vmatprep.mubr.msk.bf16.mxu0 %vm2094_vm2, %v2092_v0  ;;  %v678_v8 = vsel %vm626_vm8, %v600_v54, %v652_v62 }
 0x108   :  { %v504_v47 = vpop.f32.mrf.mxu1 }
 0x109   :  { %vm627_vm9 = vcmp.gt.f32.partialorder %v601_v2, 0.0  ;;  %v653_v3 = vmul.f32 0.2, %v601_v2  ;;  %v505_v5 = vadd.f32 %v504_v47, %v2356_v55 }
 0x10a   :  { %v1826_v7 = vpop.f32.mrf.mxu1 }
 0x10b   :  { %v679_v9 = vsel %vm627_vm9, %v601_v2, %v653_v3  ;;  %v602_v51 = vadd.f32 %v2404_v26, %v505_v5 }
 0x10c   :  { %v507_v12 = vpop.f32.mrf.mxu1  ;;  %v703_v13 = vpack.c.bf16 %v679_v9, %v678_v8 }
 0x10d   :  { %v508_v14 = vadd.f32 %v507_v12, %v2360_v59  ;;  %v654_v18 = vmul.f32 0.2, %v602_v51  ;;  %vm628_vm10 = vcmp.gt.f32.partialorder %v602_v51, 0.0 }
 0x10e   :  { %v1827_v17 = vpop.f32.mrf.mxu1  ;;  %1881 = vmatmul.mubr.msk.bf16.gmra.mxu0 %vm754_vm7, %v703_v13 }
 0x10f   :  { %v603_v19 = vadd.f32 %v2404_v26, %v508_v14  ;;  %1884 = vmatprep.mubr.msk.bf16.mxu0 %vm2094_vm2, %v2092_v0  ;;  %v680_v27 = vsel %vm628_vm10, %v602_v51, %v654_v18 }
 0x110   :  { %v512_v55 = vpop.f32.mrf.mxu1 }
 0x111   :  { %vm629_vm11 = vcmp.gt.f32.partialorder %v603_v19, 0.0  ;;  %v655_v22 = vmul.f32 0.2, %v603_v19  ;;  %v513_v23 = vadd.f32 %v512_v55, %v2364_v63 }
 0x112   :  { %v1830_v25 = vpop.f32.mrf.mxu1 }
 0x113   :  { %v681_v28 = vsel %vm629_vm11, %v603_v19, %v655_v22  ;;  %v604_v59 = vadd.f32 %v2404_v26, %v513_v23 }
 0x114   :  { %v515_v29 = vpop.f32.mrf.mxu1  ;;  %v704_v30 = vpack.c.bf16 %v681_v28, %v680_v27 }
 0x115   :  { %v516_v32 = vadd.f32 %v515_v29, %v2368_v4  ;;  %v656_v34 = vmul.f32 0.2, %v604_v59  ;;  %vm630_vm12 = vcmp.gt.f32.partialorder %v604_v59, 0.0 }
 0x116   :  { %v1831_v33 = vpop.f32.mrf.mxu1  ;;  %1885 = vmatmul.mubr.msk.bf16.gmra.mxu0 %vm754_vm7, %v704_v30 }
 0x117   :  { %v605_v35 = vadd.f32 %v2404_v26, %v516_v32  ;;  %1888 = vmatprep.mubr.msk.bf16.mxu0 %vm2094_vm2, %v2092_v0  ;;  %v682_v45 = vsel %vm630_vm12, %v604_v59, %v656_v34 }
 0x118   :  { %v520_v63 = vpop.f32.mrf.mxu1 }
 0x119   :  { %vm631_vm13 = vcmp.gt.f32.partialorder %v605_v35, 0.0  ;;  %v657_v36 = vmul.f32 0.2, %v605_v35  ;;  %v521_v38 = vadd.f32 %v520_v63, %v2379_v10 }
 0x11a   :  { %v1834_v42 = vpop.f32.mrf.mxu1 }
 0x11b   :  { %v683_v39 = vsel %vm631_vm13, %v605_v35, %v657_v36  ;;  %v606_v4 = vadd.f32 %v2404_v26, %v521_v38 }
 0x11c   :  { %v523_v46 = vpop.f32.mrf.mxu1  ;;  %v705_v49 = vpack.c.bf16 %v683_v39, %v682_v45 }
 0x11d   :  { %v524_v50 = vadd.f32 %v523_v46, %v2387_v15  ;;  %v658_v54 = vmul.f32 0.2, %v606_v4  ;;  %vm632_vm14 = vcmp.gt.f32.partialorder %v606_v4, 0.0 }
 0x11e   :  { %v1835_v53 = vpop.f32.mrf.mxu1  ;;  %1889 = vmatmul.mubr.msk.bf16.gmra.mxu0 %vm754_vm7, %v705_v49 }
 0x11f   :  { %v607_v43 = vadd.f32 %v2404_v26, %v524_v50  ;;  %1892 = vmatprep.mubr.msk.bf16.mxu0 %vm2094_vm2, %v2092_v0  ;;  %v684_v62 = vsel %vm632_vm14, %v606_v4, %v658_v54 }
 0x120   :  { %v528_v10 = vpop.f32.mrf.mxu1 }
 0x121   :  { %vm633_vm15 = vcmp.gt.f32.partialorder %v607_v43, 0.0  ;;  %v659_v57 = vmul.f32 0.2, %v607_v43  ;;  %v529_v58 = vadd.f32 %v528_v10, %v2395_v20 }
 0x122   :  { %v1838_v61 = vpop.f32.mrf.mxu1 }
 0x123   :  { %v685_v2 = vsel %vm633_vm15, %v607_v43, %v659_v57  ;;  %v608_v15 = vadd.f32 %v2404_v26, %v529_v58 }
 0x124   :  { %v531_v47 = vpop.f32.mrf.mxu1  ;;  %v706_v3 = vpack.c.bf16 %v685_v2, %v684_v62 }
 0x125   :  { %v532_v5 = vadd.f32 %v531_v47, %v2399_v24  ;;  %v660_v8 = vmul.f32 0.2, %v608_v15  ;;  %vm634_vm0 = vcmp.gt.f32.partialorder %v608_v15, 0.0 }
 0x126   :  { %v1839_v7 = vpop.f32.mrf.mxu1  ;;  %1893 = vmatmul.mubr.msk.bf16.gmra.mxu0 %vm754_vm7, %v706_v3 }
 0x127   :  { %v609_v9 = vadd.f32 %v2404_v26, %v532_v5  ;;  %1896 = vmatprep.mubr.msk.bf16.mxu0 %vm2094_vm2, %v2092_v0  ;;  %v686_v14 = vsel %vm634_vm0, %v608_v15, %v660_v8 }
 0x128   :  { %v536_v20 = vpop.f32.mrf.mxu1 }
 0x129   :  { %vm635_vm1 = vcmp.gt.f32.partialorder %v609_v9, 0.0  ;;  %v661_v51 = vmul.f32 0.2, %v609_v9  ;;  %v537_v12 = vadd.f32 %v536_v20, %v2407_v31 }
 0x12a   :  { %v1842_v13 = vpop.f32.mrf.mxu1 }
 0x12b   :  { %v687_v17 = vsel %vm635_vm1, %v609_v9, %v661_v51  ;;  %v610_v24 = vadd.f32 %v2404_v26, %v537_v12 }
 0x12c   :  { %v539_v18 = vpop.f32.mrf.mxu1  ;;  %v707_v19 = vpack.c.bf16 %v687_v17, %v686_v14 }
 0x12d   :  { %v540_v55 = vadd.f32 %v539_v18, %v2410_v41  ;;  %v662_v23 = vmul.f32 0.2, %v610_v24  ;;  %vm636_vm3 = vcmp.gt.f32.partialorder %v610_v24, 0.0 }
 0x12e   :  { %v1843_v22 = vpop.f32.mrf.mxu1  ;;  %1897 = vmatmul.mubr.msk.bf16.gmra.mxu0 %vm754_vm7, %v707_v19 }
 0x12f   :  { %v611_v25 = vadd.f32 %v2404_v26, %v540_v55  ;;  %1900 = vmatprep.mubr.msk.bf16.mxu0 %vm2094_vm2, %v2092_v0  ;;  %v688_v29 = vsel %vm636_vm3, %v610_v24, %v662_v23 }
 0x130   :  { %v544_v31 = vpop.f32.mrf.mxu1 }
 0x131   :  { %vm637_vm5 = vcmp.gt.f32.partialorder %v611_v25, 0.0  ;;  %v663_v27 = vmul.f32 0.2, %v611_v25  ;;  %v545_v28 = vadd.f32 %v544_v31, %v2342_v37 }
 0x132   :  { %v1846_v59 = vpop.f32.mrf.mxu1 }
 0x133   :  { %v689_v30 = vsel %vm637_vm5, %v611_v25, %v663_v27  ;;  %v612_v41 = vadd.f32 %v2404_v26, %v545_v28 }
 0x134   :  { %v547_v32 = vpop.f32.mrf.mxu1  ;;  %v708_v33 = vpack.c.bf16 %v689_v30, %v688_v29 }
 0x135   :  { %v548_v34 = vadd.f32 %v547_v32, %v2344_v40  ;;  %v664_v63 = vmul.f32 0.2, %v612_v41  ;;  %vm638_vm6 = vcmp.gt.f32.partialorder %v612_v41, 0.0 }
 0x136   :  { %v1847_v35 = vpop.f32.mrf.mxu1  ;;  %1901 = vmatmul.mubr.msk.bf16.gmra.mxu0 %vm754_vm7, %v708_v33 }
 0x137   :  { %v613_v36 = vadd.f32 %v2404_v26, %v548_v34  ;;  %1904 = vmatprep.mubr.msk.bf16.mxu0 %vm2094_vm2, %v2092_v0  ;;  %v690_v39 = vsel %vm638_vm6, %v612_v41, %v664_v63 }
 0x138   :  { %v552_v37 = vpop.f32.mrf.mxu1 }
 0x139   :  { %vm639_vm8 = vcmp.gt.f32.partialorder %v613_v36, 0.0  ;;  %v665_v38 = vmul.f32 0.2, %v613_v36  ;;  %v553_v42 = vadd.f32 %v552_v37, %v2346_v44 }
 0x13a   :  { %v1850_v45 = vpop.f32.mrf.mxu1 }
 0x13b   :  { %v691_v4 = vsel %vm639_vm8, %v613_v36, %v665_v38  ;;  %v614_v40 = vadd.f32 %v2404_v26, %v553_v42 }
 0x13c   :  { %v555_v46 = vpop.f32.mrf.mxu1  ;;  %v709_v49 = vpack.c.bf16 %v691_v4, %v690_v39 }
 0x13d   :  { %v556_v50 = vadd.f32 %v555_v46, %v2350_v48  ;;  %v666_v54 = vmul.f32 0.2, %v614_v40  ;;  %vm640_vm9 = vcmp.gt.f32.partialorder %v614_v40, 0.0 }
 0x13e   :  { %v1851_v53 = vpop.f32.mrf.mxu1  ;;  %1905 = vmatmul.mubr.msk.bf16.gmra.mxu0 %vm754_vm7, %v709_v49  ;;  %v2090_v49 = vld [vmem:[%s2792_s9 + $0x8] sm:$0xff]  }
 0x13f   :  { %v615_v43 = vadd.f32 %v2404_v26, %v556_v50  ;;  %1908 = vmatprep.mubr.msk.bf16.mxu0 %vm2094_vm2, %v2092_v0  ;;  %v692_v61 = vsel %vm640_vm9, %v614_v40, %v666_v54  ;;  %v2091_v50 = vld [vmem:[%s2792_s9] sm:$0xff]  }
 0x140   :  { %v560_v44 = vpop.f32.mrf.mxu1  ;;  %v2517_v53 = vld [vmem:[%s2793_s6] ss:$0 sm:$0xff] }
 0x141   :  { %vm641_vm10 = vcmp.gt.f32.partialorder %v615_v43, 0.0  ;;  %v667_v10 = vmul.f32 0.2, %v615_v43  ;;  %v561_v57 = vadd.f32 %v560_v44, %v2354_v52 }
 0x142   :  { %v1854_v58 = vpop.f32.mrf.mxu1 }
 0x143   :  { %v693_v62 = vsel %vm641_vm10, %v615_v43, %v667_v10  ;;  %v616_v48 = vadd.f32 %v2404_v26, %v561_v57 }
 0x144   :  { %v563_v2 = vpop.f32.mrf.mxu1  ;;  %v710_v15 = vpack.c.bf16 %v693_v62, %v692_v61 }
 0x145   :  { %v564_v47 = vadd.f32 %v563_v2, %v2358_v56  ;;  %v668_v5 = vmul.f32 0.2, %v616_v48  ;;  %vm642_vm11 = vcmp.gt.f32.partialorder %v616_v48, 0.0 }
 0x146   :  { %v1855_v3 = vpop.f32.mrf.mxu1  ;;  %1909 = vmatmul.mubr.msk.bf16.gmra.mxu0 %vm754_vm7, %v710_v15 }
 0x147   :  { %v617_v7 = vadd.f32 %v2404_v26, %v564_v47  ;;  %1912 = vmatprep.mubr.msk.bf16.mxu0 %vm2094_vm2, %v2092_v0  ;;  %v694_v51 = vsel %vm642_vm11, %v616_v48, %v668_v5 }
 0x148   :  { %v568_v52 = vpop.f32.mrf.mxu1 }
 0x149   :  { %vm643_vm12 = vcmp.gt.f32.partialorder %v617_v7, 0.0  ;;  %v669_v8 = vmul.f32 0.2, %v617_v7  ;;  %v569_v9 = vadd.f32 %v568_v52, %v2362_v60 }
 0x14a   :  { %v1858_v20 = vpop.f32.mrf.mxu1 }
 0x14b   :  { %v695_v12 = vsel %vm643_vm12, %v617_v7, %v669_v8  ;;  %v618_v56 = vadd.f32 %v2404_v26, %v569_v9 }
 0x14c   :  { %v571_v13 = vpop.f32.mrf.mxu1  ;;  %v711_v14 = vpack.c.bf16 %v695_v12, %v694_v51 }
 0x14d   :  { %v572_v17 = vadd.f32 %v571_v13, %v2366_v1  ;;  %v670_v18 = vmul.f32 0.2, %v618_v56  ;;  %vm644_vm13 = vcmp.gt.f32.partialorder %v618_v56, 0.0 }
 0x14e   :  { %v1859_v24 = vpop.f32.mrf.mxu1  ;;  %1913 = vmatmul.mubr.msk.bf16.gmra.mxu0 %vm754_vm7, %v711_v14 }
 0x14f   :  { %v619_v19 = vadd.f32 %v2404_v26, %v572_v17  ;;  %1916 = vmatprep.mubr.msk.bf16.mxu0 %vm2094_vm2, %v2092_v0  ;;  %v696_v25 = vsel %vm644_vm13, %v618_v56, %v670_v18 }
 0x150   :  { %v576_v60 = vpop.f32.mrf.mxu1 }
 0x151   :  { %vm645_vm14 = vcmp.gt.f32.partialorder %v619_v19, 0.0  ;;  %v671_v55 = vmul.f32 0.2, %v619_v19  ;;  %v577_v22 = vadd.f32 %v576_v60, %v2373_v6 }
 0x152   :  { %v1862_v23 = vpop.f32.mrf.mxu1 }
 0x153   :  { %v697_v31 = vsel %vm645_vm14, %v619_v19, %v671_v55  ;;  %v620_v1 = vadd.f32 %v2404_v26, %v577_v22 }
 0x154   :  { %v579_v27 = vpop.f32.mrf.mxu1  ;;  %v712_v28 = vpack.c.bf16 %v697_v31, %v696_v25 }
 0x155   :  { %v580_v59 = vadd.f32 %v579_v27, %v2381_v11  ;;  %v672_v30 = vmul.f32 0.2, %v620_v1  ;;  %vm646_vm15 = vcmp.gt.f32.partialorder %v620_v1, 0.0 }
 0x156   :  { %v1863_v29 = vpop.f32.mrf.mxu1  ;;  %1917 = vmatmul.mubr.msk.bf16.gmra.mxu0 %vm754_vm7, %v712_v28 }
 0x157   :  { %v621_v41 = vadd.f32 %v2404_v26, %v580_v59  ;;  %1920 = vmatprep.mubr.msk.bf16.mxu0 %vm2094_vm2, %v2092_v0  ;;  %v698_v35 = vsel %vm646_vm15, %v620_v1, %v672_v30 }
 0x158   :  { %v584_v6 = vpop.f32.mrf.mxu1 }
 0x159   :  { %vm647_vm0 = vcmp.gt.f32.partialorder %v621_v41, 0.0  ;;  %v673_v32 = vmul.f32 0.2, %v621_v41  ;;  %v585_v33 = vadd.f32 %v584_v6, %v2389_v16 }
 0x15a   :  { %v1866_v34 = vpop.f32.mrf.mxu1 }
 0x15b   :  { %v699_v63 = vsel %vm647_vm0, %v621_v41, %v673_v32  ;;  %v622_v11 = vadd.f32 %v2404_v26, %v585_v33 }
 0x15c   :  { %v587_v36 = vpop.f32.mrf.mxu1  ;;  %v713_v37 = vpack.c.bf16 %v699_v63, %v698_v35 }
 0x15d   :  { %v588_v38 = vadd.f32 %v587_v36, %v2397_v21  ;;  %v674_v45 = vmul.f32 0.2, %v622_v11  ;;  %vm648_vm1 = vcmp.gt.f32.partialorder %v622_v11, 0.0  ;;  %v2088_v21 = vld [vmem:[%s2792_s9 + $0x18] sm:$0xff]  }
 0x15e   :  { %v1867_v42 = vpop.f32.mrf.mxu1  ;;  %1921 = vmatmul.mubr.msk.bf16.gmra.mxu0 %vm754_vm7, %v713_v37 }
 0x15f   :  { %v623_v39 = vadd.f32 %v2404_v26, %v588_v38  ;;  %1924 = vmatprep.mubr.msk.bf16.mxu0 %vm2094_vm2, %v2092_v0  ;;  %v700_v4 = vsel %vm648_vm1, %v622_v11, %v674_v45  ;;  %1989 = vmatpush3.bf16.msra.mxu0 %v2088_v21  ;;  %v2089_v26 = vld [vmem:[%s2792_s9 + $0x10] sm:$0xff]  }
 0x160   :  { %1990 = vmatprep.subr.bf16.mxu0 %v2092_v0 }
 0x161   :  { %vm649_vm3 = vcmp.gt.f32.partialorder %v623_v39, 0.0  ;;  %v675_v16 = vmul.f32 0.2, %v623_v39 }
 0x163   :  { %v701_v40 = vsel %vm649_vm3, %v623_v39, %v675_v16  ;;  %1991 = vmatpush3.bf16.msra.mxu0 %v2089_v26 }
 0x164   :  { %v714_v46 = vpack.c.bf16 %v701_v40, %v700_v4  ;;  %1992 = vmatprep.subr.bf16.mxu0 %v2092_v0 }
 0x166   :  { %1925 = vmatmul.mubr.msk.bf16.gmra.mxu0 %vm754_vm7, %v714_v46 }
 0x167   :  { %1996 = vmatprep.mubr.msk.bf16.mxu0 %vm2094_vm2, %v2092_v0  ;;  %1993 = vmatpush3.bf16.msra.mxu0 %v2090_v49 }
 0x168   :  { %1994 = vmatprep.subr.bf16.mxu0 %v2092_v0 }
 0x16b   :  { %1995 = vmatpush3.bf16.msra.mxu0 %v2091_v50 }
 0x1c6   :  { %v828_v54 = vpop.f32.mrf.mxu0 }
 0x1c7   :  { %v829_v43 = vadd.f32 %v2517_v53, %v828_v54 }
 0x1c8   :  { %v1878_v44 = vpop.f32.mrf.mxu0 }
 0x1c9   :  { %v957_v57 = vmul.f32 0.2, %v829_v43  ;;  %vm931_vm5 = vcmp.gt.f32.partialorder %v829_v43, 0.0 }
 0x1ca   :  { %v831_v10 = vpop.f32.mrf.mxu0 }
 0x1cb   :  { %v832_v58 = vadd.f32 %v2517_v53, %v831_v10  ;;  %v983_v2 = vsel %vm931_vm5, %v829_v43, %v957_v57 }
 0x1cc   :  { %v1879_v61 = vpop.f32.mrf.mxu0 }
 0x1cd   :  { %vm932_vm6 = vcmp.gt.f32.partialorder %v832_v58, 0.0  ;;  %v958_v62 = vmul.f32 0.2, %v832_v58 }
 0x1ce   :  { %v836_v48 = vpop.f32.mrf.mxu0 }
 0x1cf   :  { %v984_v15 = vsel %vm932_vm6, %v832_v58, %v958_v62  ;;  %v837_v47 = vadd.f32 %v2517_v53, %v836_v48 }
 0x1d0   :  { %v1009_v3 = vpack.c.bf16 %v984_v15, %v983_v2  ;;  %v1882_v5 = vpop.f32.mrf.mxu0 }
 0x1d1   :  { %v959_v52 = vmul.f32 0.2, %v837_v47  ;;  %vm933_vm8 = vcmp.gt.f32.partialorder %v837_v47, 0.0 }
 0x1d2   :  { %v839_v7 = vpop.f32.mrf.mxu0  ;;  %1937 = vmatmul.mubr.msk.bf16.vlgmr.msra.gmra.mxu1 %vm754_vm7, %v1009_v3 }
 0x1d3   :  { %v840_v8 = vadd.f32 %v2517_v53, %v839_v7  ;;  %1940 = vmatprep.mubr.msk.bf16.mxu1 %vm2094_vm2, %v2092_v0  ;;  %v985_v12 = vsel %vm933_vm8, %v837_v47, %v959_v52 }
 0x1d4   :  { %v1883_v9 = vpop.f32.mrf.mxu0 }
 0x1d5   :  { %vm934_vm9 = vcmp.gt.f32.partialorder %v840_v8, 0.0  ;;  %v960_v20 = vmul.f32 0.2, %v840_v8 }
 0x1d6   :  { %v844_v51 = vpop.f32.mrf.mxu0 }
 0x1d7   :  { %v986_v56 = vsel %vm934_vm9, %v840_v8, %v960_v20  ;;  %v845_v13 = vadd.f32 %v2517_v53, %v844_v51 }
 0x1d8   :  { %v1010_v14 = vpack.c.bf16 %v986_v56, %v985_v12  ;;  %v1886_v17 = vpop.f32.mrf.mxu0 }
 0x1d9   :  { %v961_v18 = vmul.f32 0.2, %v845_v13  ;;  %vm935_vm10 = vcmp.gt.f32.partialorder %v845_v13, 0.0 }
 0x1da   :  { %v847_v24 = vpop.f32.mrf.mxu0  ;;  %1941 = vmatmul.mubr.msk.bf16.gmra.mxu1 %vm754_vm7, %v1010_v14 }
 0x1db   :  { %v848_v19 = vadd.f32 %v2517_v53, %v847_v24  ;;  %1944 = vmatprep.mubr.msk.bf16.mxu1 %vm2094_vm2, %v2092_v0  ;;  %v987_v23 = vsel %vm935_vm10, %v845_v13, %v961_v18 }
 0x1dc   :  { %v1887_v60 = vpop.f32.mrf.mxu0 }
 0x1dd   :  { %vm936_vm11 = vcmp.gt.f32.partialorder %v848_v19, 0.0  ;;  %v962_v55 = vmul.f32 0.2, %v848_v19 }
 0x1de   :  { %v852_v22 = vpop.f32.mrf.mxu0 }
 0x1df   :  { %v988_v25 = vsel %vm936_vm11, %v848_v19, %v962_v55  ;;  %v853_v31 = vadd.f32 %v2517_v53, %v852_v22 }
 0x1e0   :  { %v1011_v1 = vpack.c.bf16 %v988_v25, %v987_v23  ;;  %v1890_v27 = vpop.f32.mrf.mxu0 }
 0x1e1   :  { %v963_v59 = vmul.f32 0.2, %v853_v31  ;;  %vm937_vm12 = vcmp.gt.f32.partialorder %v853_v31, 0.0 }
 0x1e2   :  { %v855_v28 = vpop.f32.mrf.mxu0  ;;  %1945 = vmatmul.mubr.msk.bf16.gmra.mxu1 %vm754_vm7, %v1011_v1 }
 0x1e3   :  { %v856_v29 = vadd.f32 %v2517_v53, %v855_v28  ;;  %1948 = vmatprep.mubr.msk.bf16.mxu1 %vm2094_vm2, %v2092_v0  ;;  %v989_v32 = vsel %vm937_vm12, %v853_v31, %v963_v59 }
 0x1e4   :  { %v1891_v30 = vpop.f32.mrf.mxu0 }
 0x1e5   :  { %vm938_vm13 = vcmp.gt.f32.partialorder %v856_v29, 0.0  ;;  %v964_v41 = vmul.f32 0.2, %v856_v29 }
 0x1e6   :  { %v860_v6 = vpop.f32.mrf.mxu0 }
 0x1e7   :  { %v990_v33 = vsel %vm938_vm13, %v856_v29, %v964_v41  ;;  %v861_v34 = vadd.f32 %v2517_v53, %v860_v6 }
 0x1e8   :  { %v1012_v35 = vpack.c.bf16 %v990_v33, %v989_v32  ;;  %v1894_v63 = vpop.f32.mrf.mxu0 }
 0x1e9   :  { %v965_v36 = vmul.f32 0.2, %v861_v34  ;;  %vm939_vm14 = vcmp.gt.f32.partialorder %v861_v34, 0.0 }
 0x1ea   :  { %v863_v11 = vpop.f32.mrf.mxu0  ;;  %1949 = vmatmul.mubr.msk.bf16.gmra.mxu1 %vm754_vm7, %v1012_v35 }
 0x1eb   :  { %v864_v37 = vadd.f32 %v2517_v53, %v863_v11  ;;  %1952 = vmatprep.mubr.msk.bf16.mxu1 %vm2094_vm2, %v2092_v0  ;;  %v991_v39 = vsel %vm939_vm14, %v861_v34, %v965_v36 }
 0x1ec   :  { %v1895_v38 = vpop.f32.mrf.mxu0 }
 0x1ed   :  { %vm940_vm15 = vcmp.gt.f32.partialorder %v864_v37, 0.0  ;;  %v966_v42 = vmul.f32 0.2, %v864_v37 }
 0x1ee   :  { %v868_v45 = vpop.f32.mrf.mxu0 }
 0x1ef   :  { %v992_v16 = vsel %vm940_vm15, %v864_v37, %v966_v42  ;;  %v869_v4 = vadd.f32 %v2517_v53, %v868_v45 }
 0x1f0   :  { %v1013_v40 = vpack.c.bf16 %v992_v16, %v991_v39  ;;  %v1898_v46 = vpop.f32.mrf.mxu0 }
 0x1f1   :  { %v967_v26 = vmul.f32 0.2, %v869_v4  ;;  %vm941_vm0 = vcmp.gt.f32.partialorder %v869_v4, 0.0 }
 0x1f2   :  { %v871_v21 = vpop.f32.mrf.mxu0  ;;  %1953 = vmatmul.mubr.msk.bf16.gmra.mxu1 %vm754_vm7, %v1013_v40 }
 0x1f3   :  { %v872_v49 = vadd.f32 %v2517_v53, %v871_v21  ;;  %1956 = vmatprep.mubr.msk.bf16.mxu1 %vm2094_vm2, %v2092_v0  ;;  %v993_v44 = vsel %vm941_vm0, %v869_v4, %v967_v26 }
 0x1f4   :  { %v1899_v50 = vpop.f32.mrf.mxu0 }
 0x1f5   :  { %vm942_vm1 = vcmp.gt.f32.partialorder %v872_v49, 0.0  ;;  %v968_v54 = vmul.f32 0.2, %v872_v49 }
 0x1f6   :  { %v876_v43 = vpop.f32.mrf.mxu0 }
 0x1f7   :  { %v994_v10 = vsel %vm942_vm1, %v872_v49, %v968_v54  ;;  %v877_v57 = vadd.f32 %v2517_v53, %v876_v43 }
 0x1f8   :  { %v1014_v58 = vpack.c.bf16 %v994_v10, %v993_v44  ;;  %v1902_v61 = vpop.f32.mrf.mxu0 }
 0x1f9   :  { %v969_v48 = vmul.f32 0.2, %v877_v57  ;;  %vm943_vm3 = vcmp.gt.f32.partialorder %v877_v57, 0.0 }
 0x1fa   :  { %v879_v62 = vpop.f32.mrf.mxu0  ;;  %1957 = vmatmul.mubr.msk.bf16.gmra.mxu1 %vm754_vm7, %v1014_v58 }
 0x1fb   :  { %v880_v2 = vadd.f32 %v2517_v53, %v879_v62  ;;  %1960 = vmatprep.mubr.msk.bf16.mxu1 %vm2094_vm2, %v2092_v0  ;;  %v995_v5 = vsel %vm943_vm3, %v877_v57, %v969_v48 }
 0x1fc   :  { %v1903_v15 = vpop.f32.mrf.mxu0 }
 0x1fd   :  { %vm944_vm5 = vcmp.gt.f32.partialorder %v880_v2, 0.0  ;;  %v970_v47 = vmul.f32 0.2, %v880_v2 }
 0x1fe   :  { %v884_v3 = vpop.f32.mrf.mxu0 }
 0x1ff   :  { %v996_v7 = vsel %vm944_vm5, %v880_v2, %v970_v47  ;;  %v885_v52 = vadd.f32 %v2517_v53, %v884_v3 }
 0x200   :  { %v1015_v8 = vpack.c.bf16 %v996_v7, %v995_v5  ;;  %v1906_v9 = vpop.f32.mrf.mxu0 }
 0x201   :  { %v971_v51 = vmul.f32 0.2, %v885_v52  ;;  %vm945_vm6 = vcmp.gt.f32.partialorder %v885_v52, 0.0 }
 0x202   :  { %v887_v20 = vpop.f32.mrf.mxu0  ;;  %1961 = vmatmul.mubr.msk.bf16.gmra.mxu1 %vm754_vm7, %v1015_v8 }
 0x203   :  { %v888_v12 = vadd.f32 %v2517_v53, %v887_v20  ;;  %1964 = vmatprep.mubr.msk.bf16.mxu1 %vm2094_vm2, %v2092_v0  ;;  %v997_v17 = vsel %vm945_vm6, %v885_v52, %v971_v51  ;;  %v2585_v51 = vld [vmem:[%s2794_s8] ss:$0 sm:$0xff] }
 0x204   :  { %v1907_v56 = vpop.f32.mrf.mxu0 }
 0x205   :  { %vm946_vm8 = vcmp.gt.f32.partialorder %v888_v12, 0.0  ;;  %v972_v13 = vmul.f32 0.2, %v888_v12 }
 0x206   :  { %v892_v14 = vpop.f32.mrf.mxu0 }
 0x207   :  { %v998_v24 = vsel %vm946_vm8, %v888_v12, %v972_v13  ;;  %v893_v18 = vadd.f32 %v2517_v53, %v892_v14 }
 0x208   :  { %v1016_v19 = vpack.c.bf16 %v998_v24, %v997_v17  ;;  %v1910_v60 = vpop.f32.mrf.mxu0 }
 0x209   :  { %v973_v22 = vmul.f32 0.2, %v893_v18  ;;  %vm947_vm9 = vcmp.gt.f32.partialorder %v893_v18, 0.0 }
 0x20a   :  { %v895_v55 = vpop.f32.mrf.mxu0  ;;  %1965 = vmatmul.mubr.msk.bf16.gmra.mxu1 %vm754_vm7, %v1016_v19 }
 0x20b   :  { %v896_v23 = vadd.f32 %v2517_v53, %v895_v55  ;;  %1968 = vmatprep.mubr.msk.bf16.mxu1 %vm2094_vm2, %v2092_v0  ;;  %v999_v27 = vsel %vm947_vm9, %v893_v18, %v973_v22 }
 0x20c   :  { %v1911_v25 = vpop.f32.mrf.mxu0 }
 0x20d   :  { %vm948_vm10 = vcmp.gt.f32.partialorder %v896_v23, 0.0  ;;  %v974_v31 = vmul.f32 0.2, %v896_v23 }
 0x20e   :  { %v900_v1 = vpop.f32.mrf.mxu0 }
 0x20f   :  { %v1000_v28 = vsel %vm948_vm10, %v896_v23, %v974_v31  ;;  %v901_v59 = vadd.f32 %v2517_v53, %v900_v1 }
 0x210   :  { %v1017_v29 = vpack.c.bf16 %v1000_v28, %v999_v27  ;;  %v1914_v30 = vpop.f32.mrf.mxu0 }
 0x211   :  { %v975_v6 = vmul.f32 0.2, %v901_v59  ;;  %vm949_vm11 = vcmp.gt.f32.partialorder %v901_v59, 0.0 }
 0x212   :  { %v903_v41 = vpop.f32.mrf.mxu0  ;;  %1969 = vmatmul.mubr.msk.bf16.gmra.mxu1 %vm754_vm7, %v1017_v29 }
 0x213   :  { %v904_v32 = vadd.f32 %v2517_v53, %v903_v41  ;;  %1972 = vmatprep.mubr.msk.bf16.mxu1 %vm2094_vm2, %v2092_v0  ;;  %v1001_v63 = vsel %vm949_vm11, %v901_v59, %v975_v6 }
 0x214   :  { %v1915_v33 = vpop.f32.mrf.mxu0 }
 0x215   :  { %vm950_vm12 = vcmp.gt.f32.partialorder %v904_v32, 0.0  ;;  %v976_v34 = vmul.f32 0.2, %v904_v32 }
 0x216   :  { %v908_v35 = vpop.f32.mrf.mxu0 }
 0x217   :  { %v1002_v11 = vsel %vm950_vm12, %v904_v32, %v976_v34  ;;  %v909_v36 = vadd.f32 %v2517_v53, %v908_v35 }
 0x218   :  { %v1018_v37 = vpack.c.bf16 %v1002_v11, %v1001_v63  ;;  %v1918_v38 = vpop.f32.mrf.mxu0 }
 0x219   :  { %v977_v45 = vmul.f32 0.2, %v909_v36  ;;  %vm951_vm13 = vcmp.gt.f32.partialorder %v909_v36, 0.0 }
 0x21a   :  { %v911_v42 = vpop.f32.mrf.mxu0  ;;  %1973 = vmatmul.mubr.msk.bf16.gmra.mxu1 %vm754_vm7, %v1018_v37 }
 0x21b   :  { %v912_v39 = vadd.f32 %v2517_v53, %v911_v42  ;;  %1976 = vmatprep.mubr.msk.bf16.mxu1 %vm2094_vm2, %v2092_v0  ;;  %v1003_v46 = vsel %vm951_vm13, %v909_v36, %v977_v45 }
 0x21c   :  { %v1919_v16 = vpop.f32.mrf.mxu0 }
 0x21d   :  { %vm952_vm14 = vcmp.gt.f32.partialorder %v912_v39, 0.0  ;;  %v978_v4 = vmul.f32 0.2, %v912_v39 }
 0x21e   :  { %v916_v40 = vpop.f32.mrf.mxu0 }
 0x21f   :  { %v1004_v21 = vsel %vm952_vm14, %v912_v39, %v978_v4  ;;  %v917_v26 = vadd.f32 %v2517_v53, %v916_v40 }
 0x220   :  { %v1019_v49 = vpack.c.bf16 %v1004_v21, %v1003_v46  ;;  %v1922_v50 = vpop.f32.mrf.mxu0 }
 0x221   :  { %v979_v43 = vmul.f32 0.2, %v917_v26  ;;  %vm953_vm15 = vcmp.gt.f32.partialorder %v917_v26, 0.0 }
 0x222   :  { %v919_v54 = vpop.f32.mrf.mxu0  ;;  %1977 = vmatmul.mubr.msk.bf16.gmra.mxu1 %vm754_vm7, %v1019_v49 }
 0x223   :  { %v920_v44 = vadd.f32 %v2517_v53, %v919_v54  ;;  %1980 = vmatprep.mubr.msk.bf16.mxu1 %vm2094_vm2, %v2092_v0  ;;  %v1005_v61 = vsel %vm953_vm15, %v917_v26, %v979_v43 }
 0x224   :  { %v1923_v10 = vpop.f32.mrf.mxu0 }
 0x225   :  { %vm954_vm0 = vcmp.gt.f32.partialorder %v920_v44, 0.0  ;;  %v980_v57 = vmul.f32 0.2, %v920_v44 }
 0x226   :  { %v924_v58 = vpop.f32.mrf.mxu0 }
 0x227   :  { %v1006_v62 = vsel %vm954_vm0, %v920_v44, %v980_v57  ;;  %v925_v48 = vadd.f32 %v2517_v53, %v924_v58 }
 0x228   :  { %v1020_v2 = vpack.c.bf16 %v1006_v62, %v1005_v61  ;;  %v1926_v15 = vpop.f32.mrf.mxu0 }
 0x229   :  { %v981_v3 = vmul.f32 0.2, %v925_v48  ;;  %vm955_vm1 = vcmp.gt.f32.partialorder %v925_v48, 0.0 }
 0x22a   :  { %v927_v47 = vpop.f32.mrf.mxu0  ;;  %1981 = vmatmul.mubr.msk.bf16.gmra.mxu1 %vm754_vm7, %v1020_v2 }
 0x22b   :  { %v928_v5 = vadd.f32 %v2517_v53, %v927_v47  ;;  %1984 = vmatprep.mubr.msk.bf16.mxu1 %vm2094_vm2, %v2092_v0  ;;  %v1007_v8 = vsel %vm955_vm1, %v925_v48, %v981_v3 }
 0x22c   :  { %v1927_v7 = vpop.f32.mrf.mxu0 }
 0x22d   :  { %vm956_vm3 = vcmp.gt.f32.partialorder %v928_v5, 0.0  ;;  %v982_v52 = vmul.f32 0.2, %v928_v5 }
 0x22f   :  { %v1008_v9 = vsel %vm956_vm3, %v928_v5, %v982_v52 }
 0x230   :  { %v1021_v20 = vpack.c.bf16 %v1008_v9, %v1007_v8 }
 0x232   :  { %1985 = vmatmul.mubr.msk.bf16.gmra.mxu1 %vm754_vm7, %v1021_v20 }
 0x292   :  { %v1134_v12 = vpop.f32.mrf.mxu1 }
 0x293   :  { %v1135_v53 = vadd.f32 %v2585_v51, %v1134_v12 }
 0x294   :  { %v1938_v56 = vpop.f32.mrf.mxu1 }
 0x295   :  { %v1263_v14 = vmul.f32 0.2, %v1135_v53  ;;  %vm1237_vm5 = vcmp.gt.f32.partialorder %v1135_v53, 0.0 }
 0x296   :  { %v1137_v13 = vpop.f32.mrf.mxu1 }
 0x297   :  { %v1138_v17 = vadd.f32 %v2585_v51, %v1137_v13  ;;  %v1289_v60 = vsel %vm1237_vm5, %v1135_v53, %v1263_v14 }
 0x298   :  { %v1939_v24 = vpop.f32.mrf.mxu1 }
 0x299   :  { %vm1238_vm6 = vcmp.gt.f32.partialorder %v1138_v17, 0.0  ;;  %v1264_v18 = vmul.f32 0.2, %v1138_v17 }
 0x29a   :  { %v1142_v19 = vpop.f32.mrf.mxu1 }
 0x29b   :  { %v1290_v55 = vsel %vm1238_vm6, %v1138_v17, %v1264_v18  ;;  %v1143_v22 = vadd.f32 %v2585_v51, %v1142_v19 }
 0x29c   :  { %v1315_v23 = vpack.c.bf16 %v1290_v55, %v1289_v60  ;;  %v1942_v25 = vpop.f32.mrf.mxu1 }
 0x29d   :  { %v1265_v1 = vmul.f32 0.2, %v1143_v22  ;;  %vm1239_vm8 = vcmp.gt.f32.partialorder %v1143_v22, 0.0 }
 0x29e   :  { %v1145_v31 = vpop.f32.mrf.mxu1  ;;  %1997 = vmatmul.mubr.msk.bf16.vlgmr.msra.gmra.mxu0 %vm754_vm7, %v1315_v23 }
 0x29f   :  { %v1146_v27 = vadd.f32 %v2585_v51, %v1145_v31  ;;  %2000 = vmatprep.mubr.msk.bf16.mxu0 %vm2094_vm2, %v2092_v0  ;;  %v1291_v30 = vsel %vm1239_vm8, %v1143_v22, %v1265_v1 }
 0x2a0   :  { %v1943_v28 = vpop.f32.mrf.mxu1 }
 0x2a1   :  { %vm1240_vm9 = vcmp.gt.f32.partialorder %v1146_v27, 0.0  ;;  %v1266_v59 = vmul.f32 0.2, %v1146_v27 }
 0x2a2   :  { %v1150_v29 = vpop.f32.mrf.mxu1 }
 0x2a3   :  { %v1292_v41 = vsel %vm1240_vm9, %v1146_v27, %v1266_v59  ;;  %v1151_v6 = vadd.f32 %v2585_v51, %v1150_v29 }
 0x2a4   :  { %v1316_v32 = vpack.c.bf16 %v1292_v41, %v1291_v30  ;;  %v1946_v33 = vpop.f32.mrf.mxu1 }
 0x2a5   :  { %v1267_v35 = vmul.f32 0.2, %v1151_v6  ;;  %vm1241_vm10 = vcmp.gt.f32.partialorder %v1151_v6, 0.0 }
 0x2a6   :  { %v1153_v34 = vpop.f32.mrf.mxu1  ;;  %2001 = vmatmul.mubr.msk.bf16.gmra.mxu0 %vm754_vm7, %v1316_v32 }
 0x2a7   :  { %v1154_v63 = vadd.f32 %v2585_v51, %v1153_v34  ;;  %2004 = vmatprep.mubr.msk.bf16.mxu0 %vm2094_vm2, %v2092_v0  ;;  %v1293_v38 = vsel %vm1241_vm10, %v1151_v6, %v1267_v35 }
 0x2a8   :  { %v1947_v11 = vpop.f32.mrf.mxu1 }
 0x2a9   :  { %vm1242_vm11 = vcmp.gt.f32.partialorder %v1154_v63, 0.0  ;;  %v1268_v36 = vmul.f32 0.2, %v1154_v63 }
 0x2aa   :  { %v1158_v37 = vpop.f32.mrf.mxu1 }
 0x2ab   :  { %v1294_v42 = vsel %vm1242_vm11, %v1154_v63, %v1268_v36  ;;  %v1159_v45 = vadd.f32 %v2585_v51, %v1158_v37 }
 0x2ac   :  { %v1317_v39 = vpack.c.bf16 %v1294_v42, %v1293_v38  ;;  %v1950_v16 = vpop.f32.mrf.mxu1 }
 0x2ad   :  { %v1269_v40 = vmul.f32 0.2, %v1159_v45  ;;  %vm1243_vm12 = vcmp.gt.f32.partialorder %v1159_v45, 0.0 }
 0x2ae   :  { %v1161_v4 = vpop.f32.mrf.mxu1  ;;  %2005 = vmatmul.mubr.msk.bf16.gmra.mxu0 %vm754_vm7, %v1317_v39 }
 0x2af   :  { %v1162_v46 = vadd.f32 %v2585_v51, %v1161_v4  ;;  %2008 = vmatprep.mubr.msk.bf16.mxu0 %vm2094_vm2, %v2092_v0  ;;  %v1295_v50 = vsel %vm1243_vm12, %v1159_v45, %v1269_v40 }
 0x2b0   :  { %v1951_v21 = vpop.f32.mrf.mxu1 }
 0x2b1   :  { %vm1244_vm13 = vcmp.gt.f32.partialorder %v1162_v46, 0.0  ;;  %v1270_v26 = vmul.f32 0.2, %v1162_v46 }
 0x2b2   :  { %v1166_v49 = vpop.f32.mrf.mxu1 }
 0x2b3   :  { %v1296_v54 = vsel %vm1244_vm13, %v1162_v46, %v1270_v26  ;;  %v1167_v43 = vadd.f32 %v2585_v51, %v1166_v49 }
 0x2b4   :  { %v1318_v44 = vpack.c.bf16 %v1296_v54, %v1295_v50  ;;  %v1954_v10 = vpop.f32.mrf.mxu1 }
 0x2b5   :  { %v1271_v58 = vmul.f32 0.2, %v1167_v43  ;;  %vm1245_vm14 = vcmp.gt.f32.partialorder %v1167_v43, 0.0 }
 0x2b6   :  { %v1169_v57 = vpop.f32.mrf.mxu1  ;;  %2009 = vmatmul.mubr.msk.bf16.gmra.mxu0 %vm754_vm7, %v1318_v44 }
 0x2b7   :  { %v1170_v61 = vadd.f32 %v2585_v51, %v1169_v57  ;;  %2012 = vmatprep.mubr.msk.bf16.mxu0 %vm2094_vm2, %v2092_v0  ;;  %v1297_v15 = vsel %vm1245_vm14, %v1167_v43, %v1271_v58 }
 0x2b8   :  { %v1955_v62 = vpop.f32.mrf.mxu1 }
 0x2b9   :  { %vm1246_vm15 = vcmp.gt.f32.partialorder %v1170_v61, 0.0  ;;  %v1272_v48 = vmul.f32 0.2, %v1170_v61 }
 0x2ba   :  { %v1174_v2 = vpop.f32.mrf.mxu1 }
 0x2bb   :  { %v1298_v47 = vsel %vm1246_vm15, %v1170_v61, %v1272_v48  ;;  %v1175_v3 = vadd.f32 %v2585_v51, %v1174_v2 }
 0x2bc   :  { %v1319_v5 = vpack.c.bf16 %v1298_v47, %v1297_v15  ;;  %v1958_v7 = vpop.f32.mrf.mxu1 }
 0x2bd   :  { %v1273_v8 = vmul.f32 0.2, %v1175_v3  ;;  %vm1247_vm0 = vcmp.gt.f32.partialorder %v1175_v3, 0.0 }
 0x2be   :  { %v1177_v52 = vpop.f32.mrf.mxu1  ;;  %2013 = vmatmul.mubr.msk.bf16.gmra.mxu0 %vm754_vm7, %v1319_v5 }
 0x2bf   :  { %v1178_v9 = vadd.f32 %v2585_v51, %v1177_v52  ;;  %2016 = vmatprep.mubr.msk.bf16.mxu0 %vm2094_vm2, %v2092_v0  ;;  %v1299_v56 = vsel %vm1247_vm0, %v1175_v3, %v1273_v8 }
 0x2c0   :  { %v1959_v20 = vpop.f32.mrf.mxu1 }
 0x2c1   :  { %vm1248_vm1 = vcmp.gt.f32.partialorder %v1178_v9, 0.0  ;;  %v1274_v12 = vmul.f32 0.2, %v1178_v9 }
 0x2c2   :  { %v1182_v53 = vpop.f32.mrf.mxu1 }
 0x2c3   :  { %v1300_v13 = vsel %vm1248_vm1, %v1178_v9, %v1274_v12  ;;  %v1183_v14 = vadd.f32 %v2585_v51, %v1182_v53 }
 0x2c4   :  { %v1320_v17 = vpack.c.bf16 %v1300_v13, %v1299_v56  ;;  %v1962_v24 = vpop.f32.mrf.mxu1 }
 0x2c5   :  { %v1275_v19 = vmul.f32 0.2, %v1183_v14  ;;  %vm1249_vm3 = vcmp.gt.f32.partialorder %v1183_v14, 0.0 }
 0x2c6   :  { %v1185_v18 = vpop.f32.mrf.mxu1  ;;  %2017 = vmatmul.mubr.msk.bf16.gmra.mxu0 %vm754_vm7, %v1320_v17 }
 0x2c7   :  { %v1186_v60 = vadd.f32 %v2585_v51, %v1185_v18  ;;  %2020 = vmatprep.mubr.msk.bf16.mxu0 %vm2094_vm2, %v2092_v0  ;;  %v1301_v25 = vsel %vm1249_vm3, %v1183_v14, %v1275_v19 }
 0x2c8   :  { %v1963_v55 = vpop.f32.mrf.mxu1 }
 0x2c9   :  { %vm1250_vm5 = vcmp.gt.f32.partialorder %v1186_v60, 0.0  ;;  %v1276_v22 = vmul.f32 0.2, %v1186_v60 }
 0x2ca   :  { %v1190_v23 = vpop.f32.mrf.mxu1 }
 0x2cb   :  { %v1302_v31 = vsel %vm1250_vm5, %v1186_v60, %v1276_v22  ;;  %v1191_v1 = vadd.f32 %v2585_v51, %v1190_v23 }
 0x2cc   :  { %v1321_v27 = vpack.c.bf16 %v1302_v31, %v1301_v25  ;;  %v1966_v28 = vpop.f32.mrf.mxu1 }
 0x2cd   :  { %v1277_v29 = vmul.f32 0.2, %v1191_v1  ;;  %vm1251_vm6 = vcmp.gt.f32.partialorder %v1191_v1, 0.0 }
 0x2ce   :  { %v1193_v59 = vpop.f32.mrf.mxu1  ;;  %2021 = vmatmul.mubr.msk.bf16.gmra.mxu0 %vm754_vm7, %v1321_v27 }
 0x2cf   :  { %v1194_v30 = vadd.f32 %v2585_v51, %v1193_v59  ;;  %2024 = vmatprep.mubr.msk.bf16.mxu0 %vm2094_vm2, %v2092_v0  ;;  %v1303_v33 = vsel %vm1251_vm6, %v1191_v1, %v1277_v29  ;;  %v2653_v29 = vld [vmem:[%s2795_s10] ss:$0 sm:$0xff] }
 0x2d0   :  { %v1967_v41 = vpop.f32.mrf.mxu1 }
 0x2d1   :  { %vm1252_vm8 = vcmp.gt.f32.partialorder %v1194_v30, 0.0  ;;  %v1278_v6 = vmul.f32 0.2, %v1194_v30 }
 0x2d2   :  { %v1198_v32 = vpop.f32.mrf.mxu1 }
 0x2d3   :  { %v1304_v34 = vsel %vm1252_vm8, %v1194_v30, %v1278_v6  ;;  %v1199_v35 = vadd.f32 %v2585_v51, %v1198_v32 }
 0x2d4   :  { %v1322_v63 = vpack.c.bf16 %v1304_v34, %v1303_v33  ;;  %v1970_v11 = vpop.f32.mrf.mxu1 }
 0x2d5   :  { %v1279_v37 = vmul.f32 0.2, %v1199_v35  ;;  %vm1253_vm9 = vcmp.gt.f32.partialorder %v1199_v35, 0.0 }
 0x2d6   :  { %v1201_v36 = vpop.f32.mrf.mxu1  ;;  %2025 = vmatmul.mubr.msk.bf16.gmra.mxu0 %vm754_vm7, %v1322_v63 }
 0x2d7   :  { %v1202_v38 = vadd.f32 %v2585_v51, %v1201_v36  ;;  %2028 = vmatprep.mubr.msk.bf16.mxu0 %vm2094_vm2, %v2092_v0  ;;  %v1305_v16 = vsel %vm1253_vm9, %v1199_v35, %v1279_v37 }
 0x2d8   :  { %v1971_v42 = vpop.f32.mrf.mxu1 }
 0x2d9   :  { %vm1254_vm10 = vcmp.gt.f32.partialorder %v1202_v38, 0.0  ;;  %v1280_v45 = vmul.f32 0.2, %v1202_v38 }
 0x2da   :  { %v1206_v39 = vpop.f32.mrf.mxu1 }
 0x2db   :  { %v1306_v4 = vsel %vm1254_vm10, %v1202_v38, %v1280_v45  ;;  %v1207_v40 = vadd.f32 %v2585_v51, %v1206_v39 }
 0x2dc   :  { %v1323_v46 = vpack.c.bf16 %v1306_v4, %v1305_v16  ;;  %v1974_v21 = vpop.f32.mrf.mxu1 }
 0x2dd   :  { %v1281_v49 = vmul.f32 0.2, %v1207_v40  ;;  %vm1255_vm11 = vcmp.gt.f32.partialorder %v1207_v40, 0.0 }
 0x2de   :  { %v1209_v26 = vpop.f32.mrf.mxu1  ;;  %2029 = vmatmul.mubr.msk.bf16.gmra.mxu0 %vm754_vm7, %v1323_v46 }
 0x2df   :  { %v1210_v50 = vadd.f32 %v2585_v51, %v1209_v26  ;;  %2032 = vmatprep.mubr.msk.bf16.mxu0 %vm2094_vm2, %v2092_v0  ;;  %v1307_v10 = vsel %vm1255_vm11, %v1207_v40, %v1281_v49 }
 0x2e0   :  { %v1975_v54 = vpop.f32.mrf.mxu1 }
 0x2e1   :  { %vm1256_vm12 = vcmp.gt.f32.partialorder %v1210_v50, 0.0  ;;  %v1282_v43 = vmul.f32 0.2, %v1210_v50 }
 0x2e2   :  { %v1214_v44 = vpop.f32.mrf.mxu1 }
 0x2e3   :  { %v1308_v57 = vsel %vm1256_vm12, %v1210_v50, %v1282_v43  ;;  %v1215_v58 = vadd.f32 %v2585_v51, %v1214_v44 }
 0x2e4   :  { %v1324_v61 = vpack.c.bf16 %v1308_v57, %v1307_v10  ;;  %v1978_v62 = vpop.f32.mrf.mxu1 }
 0x2e5   :  { %v1283_v2 = vmul.f32 0.2, %v1215_v58  ;;  %vm1257_vm13 = vcmp.gt.f32.partialorder %v1215_v58, 0.0 }
 0x2e6   :  { %v1217_v48 = vpop.f32.mrf.mxu1  ;;  %2033 = vmatmul.mubr.msk.bf16.gmra.mxu0 %vm754_vm7, %v1324_v61 }
 0x2e7   :  { %v1218_v15 = vadd.f32 %v2585_v51, %v1217_v48  ;;  %2036 = vmatprep.mubr.msk.bf16.mxu0 %vm2094_vm2, %v2092_v0  ;;  %v1309_v7 = vsel %vm1257_vm13, %v1215_v58, %v1283_v2 }
 0x2e8   :  { %v1979_v47 = vpop.f32.mrf.mxu1 }
 0x2e9   :  { %vm1258_vm14 = vcmp.gt.f32.partialorder %v1218_v15, 0.0  ;;  %v1284_v3 = vmul.f32 0.2, %v1218_v15 }
 0x2ea   :  { %v1222_v5 = vpop.f32.mrf.mxu1 }
 0x2eb   :  { %v1310_v52 = vsel %vm1258_vm14, %v1218_v15, %v1284_v3  ;;  %v1223_v8 = vadd.f32 %v2585_v51, %v1222_v5 }
 0x2ec   :  { %v1325_v9 = vpack.c.bf16 %v1310_v52, %v1309_v7  ;;  %v1982_v20 = vpop.f32.mrf.mxu1 }
 0x2ed   :  { %v1285_v53 = vmul.f32 0.2, %v1223_v8  ;;  %vm1259_vm15 = vcmp.gt.f32.partialorder %v1223_v8, 0.0 }
 0x2ee   :  { %v1225_v12 = vpop.f32.mrf.mxu1  ;;  %2037 = vmatmul.mubr.msk.bf16.gmra.mxu0 %vm754_vm7, %v1325_v9 }
 0x2ef   :  { %v1226_v56 = vadd.f32 %v2585_v51, %v1225_v12  ;;  %2040 = vmatprep.mubr.msk.bf16.mxu0 %vm2094_vm2, %v2092_v0  ;;  %v1311_v24 = vsel %vm1259_vm15, %v1223_v8, %v1285_v53 }
 0x2f0   :  { %v1983_v13 = vpop.f32.mrf.mxu1 }
 0x2f1   :  { %vm1260_vm0 = vcmp.gt.f32.partialorder %v1226_v56, 0.0  ;;  %v1286_v14 = vmul.f32 0.2, %v1226_v56 }
 0x2f2   :  { %v1230_v17 = vpop.f32.mrf.mxu1 }
 0x2f3   :  { %v1312_v18 = vsel %vm1260_vm0, %v1226_v56, %v1286_v14  ;;  %v1231_v19 = vadd.f32 %v2585_v51, %v1230_v17 }
 0x2f4   :  { %v1326_v60 = vpack.c.bf16 %v1312_v18, %v1311_v24  ;;  %v1986_v55 = vpop.f32.mrf.mxu1 }
 0x2f5   :  { %v1287_v23 = vmul.f32 0.2, %v1231_v19  ;;  %vm1261_vm1 = vcmp.gt.f32.partialorder %v1231_v19, 0.0 }
 0x2f6   :  { %v1233_v22 = vpop.f32.mrf.mxu1  ;;  %2041 = vmatmul.mubr.msk.bf16.gmra.mxu0 %vm754_vm7, %v1326_v60 }
 0x2f7   :  { %v1234_v25 = vadd.f32 %v2585_v51, %v1233_v22  ;;  %2044 = vmatprep.mubr.msk.bf16.mxu0 %vm2094_vm2, %v2092_v0  ;;  %v1313_v27 = vsel %vm1261_vm1, %v1231_v19, %v1287_v23 }
 0x2f8   :  { %v1987_v31 = vpop.f32.mrf.mxu1 }
 0x2f9   :  { %vm1262_vm3 = vcmp.gt.f32.partialorder %v1234_v25, 0.0  ;;  %v1288_v1 = vmul.f32 0.2, %v1234_v25 }
 0x2fb   :  { %v1314_v28 = vsel %vm1262_vm3, %v1234_v25, %v1288_v1 }
 0x2fc   :  { %v1327_v59 = vpack.c.bf16 %v1314_v28, %v1313_v27 }
 0x2fe   :  { %2045 = vmatmul.mubr.msk.bf16.gmra.mxu0 %vm754_vm7, %v1327_v59 }
 0x35e   :  { %v1440_v30 = vpop.f32.mrf.mxu0 }
 0x35f   :  { %v1441_v51 = vadd.f32 %v2653_v29, %v1440_v30 }
 0x360   :  { %v1998_v41 = vpop.f32.mrf.mxu0 }
 0x361   :  { %1543 = vst.msk [vmem:[%s2796_s11] sm:$0xff] %vm414_vm4, %v1441_v51 }
 0x362   :  { %v1443_v0 = vpop.f32.mrf.mxu0 }
 0x363   :  { %v1444_v6 = vadd.f32 %v2653_v29, %v1443_v0 }
 0x364   :  { %v1999_v32 = vpop.f32.mrf.mxu0 }
 0x365   :  { %1544 = vst.msk [vmem:[%s2796_s11 + $0x8] sm:$0xff] %vm414_vm4, %v1444_v6 }
 0x366   :  { %v1448_v33 = vpop.f32.mrf.mxu0 }
 0x367   :  { %v1449_v34 = vadd.f32 %v2653_v29, %v1448_v33 }
 0x368   :  { %v2002_v35 = vpop.f32.mrf.mxu0 }
 0x369   :  { %1545 = vst.msk [vmem:[%s2796_s11 + $0x10] sm:$0xff] %vm414_vm4, %v1449_v34 }
 0x36a   :  { %v1451_v63 = vpop.f32.mrf.mxu0 }
 0x36b   :  { %v1452_v11 = vadd.f32 %v2653_v29, %v1451_v63 }
 0x36c   :  { %v2003_v36 = vpop.f32.mrf.mxu0 }
 0x36d   :  { %1546 = vst.msk [vmem:[%s2796_s11 + $0x18] sm:$0xff] %vm414_vm4, %v1452_v11 }
 0x36e   :  { %v1456_v37 = vpop.f32.mrf.mxu0 }
 0x36f   :  { %v1457_v38 = vadd.f32 %v2653_v29, %v1456_v37 }
 0x370   :  { %v2006_v42 = vpop.f32.mrf.mxu0 }
 0x371   :  { %1547 = vst.msk [vmem:[%s2796_s11 + $0x20] sm:$0xff] %vm414_vm4, %v1457_v38 }
 0x372   :  { %v1459_v45 = vpop.f32.mrf.mxu0 }
 0x373   :  { %v1460_v39 = vadd.f32 %v2653_v29, %v1459_v45 }
 0x374   :  { %v2007_v16 = vpop.f32.mrf.mxu0 }
 0x375   :  { %1548 = vst.msk [vmem:[%s2796_s11 + $0x28] sm:$0xff] %vm414_vm4, %v1460_v39 }
 0x376   :  { %v1464_v4 = vpop.f32.mrf.mxu0 }
 0x377   :  { %v1465_v40 = vadd.f32 %v2653_v29, %v1464_v4 }
 0x378   :  { %v2010_v46 = vpop.f32.mrf.mxu0 }
 0x379   :  { %1549 = vst.msk [vmem:[%s2796_s11 + $0x30] sm:$0xff] %vm414_vm4, %v1465_v40 }
 0x37a   :  { %v1467_v21 = vpop.f32.mrf.mxu0 }
 0x37b   :  { %v1468_v26 = vadd.f32 %v2653_v29, %v1467_v21 }
 0x37c   :  { %v2011_v49 = vpop.f32.mrf.mxu0 }
 0x37d   :  { %1550 = vst.msk [vmem:[%s2796_s11 + $0x38] sm:$0xff] %vm414_vm4, %v1468_v26 }
 0x37e   :  { %v1472_v50 = vpop.f32.mrf.mxu0 }
 0x37f   :  { %v1473_v54 = vadd.f32 %v2653_v29, %v1472_v50 }
 0x380   :  { %v2014_v43 = vpop.f32.mrf.mxu0 }
 0x381   :  { %1551 = vst.msk [vmem:[%s2796_s11 + $0x40] sm:$0xff] %vm414_vm4, %v1473_v54 }
 0x382   :  { %v1475_v44 = vpop.f32.mrf.mxu0 }
 0x383   :  { %v1476_v10 = vadd.f32 %v2653_v29, %v1475_v44 }
 0x384   :  { %v2015_v57 = vpop.f32.mrf.mxu0 }
 0x385   :  { %1552 = vst.msk [vmem:[%s2796_s11 + $0x48] sm:$0xff] %vm414_vm4, %v1476_v10 }
 0x386   :  { %v1480_v58 = vpop.f32.mrf.mxu0 }
 0x387   :  { %v1481_v61 = vadd.f32 %v2653_v29, %v1480_v58 }
 0x388   :  { %v2018_v62 = vpop.f32.mrf.mxu0 }
 0x389   :  { %1553 = vst.msk [vmem:[%s2796_s11 + $0x50] sm:$0xff] %vm414_vm4, %v1481_v61 }
 0x38a   :  { %v1483_v48 = vpop.f32.mrf.mxu0 }
 0x38b   :  { %v1484_v2 = vadd.f32 %v2653_v29, %v1483_v48 }
 0x38c   :  { %v2019_v15 = vpop.f32.mrf.mxu0 }
 0x38d   :  { %1554 = vst.msk [vmem:[%s2796_s11 + $0x58] sm:$0xff] %vm414_vm4, %v1484_v2 }
 0x38e   :  { %v1488_v47 = vpop.f32.mrf.mxu0 }
 0x38f   :  { %v1489_v3 = vadd.f32 %v2653_v29, %v1488_v47 }
 0x390   :  { %v2022_v5 = vpop.f32.mrf.mxu0 }
 0x391   :  { %1555 = vst.msk [vmem:[%s2796_s11 + $0x60] sm:$0xff] %vm414_vm4, %v1489_v3 }
 0x392   :  { %v1491_v7 = vpop.f32.mrf.mxu0 }
 0x393   :  { %v1492_v52 = vadd.f32 %v2653_v29, %v1491_v7 }
 0x394   :  { %v2023_v8 = vpop.f32.mrf.mxu0 }
 0x395   :  { %1556 = vst.msk [vmem:[%s2796_s11 + $0x68] sm:$0xff] %vm414_vm4, %v1492_v52 }
 0x396   :  { %v1496_v9 = vpop.f32.mrf.mxu0 }
 0x397   :  { %v1497_v20 = vadd.f32 %v2653_v29, %v1496_v9 }
 0x398   :  { %v2026_v12 = vpop.f32.mrf.mxu0 }
 0x399   :  { %1557 = vst.msk [vmem:[%s2796_s11 + $0x70] sm:$0xff] %vm414_vm4, %v1497_v20 }
 0x39a   :  { %v1499_v53 = vpop.f32.mrf.mxu0 }
 0x39b   :  { %v1500_v56 = vadd.f32 %v2653_v29, %v1499_v53 }
 0x39c   :  { %v2027_v13 = vpop.f32.mrf.mxu0 }
 0x39d   :  { %1558 = vst.msk [vmem:[%s2796_s11 + $0x78] sm:$0xff] %vm414_vm4, %v1500_v56 }
 0x39e   :  { %v1504_v14 = vpop.f32.mrf.mxu0 }
 0x39f   :  { %v1505_v17 = vadd.f32 %v2653_v29, %v1504_v14 }
 0x3a0   :  { %v2030_v24 = vpop.f32.mrf.mxu0 }
 0x3a1   :  { %1559 = vst.msk [vmem:[%s2796_s11 + $0x80] sm:$0xff] %vm414_vm4, %v1505_v17 }
 0x3a2   :  { %v1507_v18 = vpop.f32.mrf.mxu0 }
 0x3a3   :  { %v1508_v19 = vadd.f32 %v2653_v29, %v1507_v18 }
 0x3a4   :  { %v2031_v60 = vpop.f32.mrf.mxu0 }
 0x3a5   :  { %1560 = vst.msk [vmem:[%s2796_s11 + $0x88] sm:$0xff] %vm414_vm4, %v1508_v19 }
 0x3a6   :  { %v1512_v55 = vpop.f32.mrf.mxu0 }
 0x3a7   :  { %v1513_v22 = vadd.f32 %v2653_v29, %v1512_v55 }
 0x3a8   :  { %v2034_v23 = vpop.f32.mrf.mxu0 }
 0x3a9   :  { %1561 = vst.msk [vmem:[%s2796_s11 + $0x90] sm:$0xff] %vm414_vm4, %v1513_v22 }
 0x3aa   :  { %v1515_v25 = vpop.f32.mrf.mxu0 }
 0x3ab   :  { %v1516_v31 = vadd.f32 %v2653_v29, %v1515_v25 }
 0x3ac   :  { %v2035_v1 = vpop.f32.mrf.mxu0 }
 0x3ad   :  { %1562 = vst.msk [vmem:[%s2796_s11 + $0x98] sm:$0xff] %vm414_vm4, %v1516_v31 }
 0x3ae   :  { %v1520_v27 = vpop.f32.mrf.mxu0 }
 0x3af   :  { %v1521_v28 = vadd.f32 %v2653_v29, %v1520_v27 }
 0x3b0   :  { %v2038_v59 = vpop.f32.mrf.mxu0 }
 0x3b1   :  { %1563 = vst.msk [vmem:[%s2796_s11 + $0xa0] sm:$0xff] %vm414_vm4, %v1521_v28 }
 0x3b2   :  { %v1523_v30 = vpop.f32.mrf.mxu0 }
 0x3b3   :  { %v1524_v51 = vadd.f32 %v2653_v29, %v1523_v30 }
 0x3b4   :  { %v2039_v41 = vpop.f32.mrf.mxu0 }
 0x3b5   :  { %1564 = vst.msk [vmem:[%s2796_s11 + $0xa8] sm:$0xff] %vm414_vm4, %v1524_v51 }
 0x3b6   :  { %v1528_v0 = vpop.f32.mrf.mxu0 }
 0x3b7   :  { %v1529_v6 = vadd.f32 %v2653_v29, %v1528_v0 }
 0x3b8   :  { %v2042_v32 = vpop.f32.mrf.mxu0 }
 0x3b9   :  { %1565 = vst.msk [vmem:[%s2796_s11 + $0xb0] sm:$0xff] %vm414_vm4, %v1529_v6 }
 0x3ba   :  { %v1531_v33 = vpop.f32.mrf.mxu0 }
 0x3bb   :  { %v1532_v34 = vadd.f32 %v2653_v29, %v1531_v33 }
 0x3bc   :  { %v2043_v35 = vpop.f32.mrf.mxu0 }
 0x3bd   :  { %1566 = vst.msk [vmem:[%s2796_s11 + $0xb8] sm:$0xff] %vm414_vm4, %v1532_v34 }
 0x3be   :  { %v1536_v63 = vpop.f32.mrf.mxu0 }
 0x3bf   :  { %v1537_v11 = vadd.f32 %v2653_v29, %v1536_v63 }
 0x3c0   :  { %v2046_v36 = vpop.f32.mrf.mxu0 }
 0x3c1   :  { %1567 = vst.msk [vmem:[%s2796_s11 + $0xc0] sm:$0xff] %vm414_vm4, %v1537_v11 }
 0x3c2   :  { %v1539_v37 = vpop.f32.mrf.mxu0 }
 0x3c3   :  { %v1540_v38 = vadd.f32 %v2653_v29, %v1539_v37 }
 0x3c4   :  { %v2047_v42 = vpop.f32.mrf.mxu0 }
 0x3c5   :  { %1568 = vst.msk [vmem:[%s2796_s11 + $0xc8] sm:$0xff] %vm414_vm4, %v1540_v38 }

</bundles_post_ra>
